<compile_context>
chip_gen: v7x
topology: tpu7x:2x2x1
jax: 0.10.0
libtpu: 0.0.40
codegen_flags: <defaults>
</compile_context>

<pallas_src>
import numpy as np
import jax
import jax.numpy as jnp
from jax.experimental import pallas as pl
from jax.experimental.pallas import tpu as pltpu

LANE = 128   # TPU lane width; every layer-output / weight-N dim is padded to this
SUB = 8      # sublane granularity
TG_CAP = 256  # per-tile group cap: bounds live f32 temporaries for v7x's 64 MiB VMEM


def _round_up(x, m):
    return ((x + m - 1) // m) * m


def _vmem_limit_bytes():
    # Per-generation scoped-VMEM budget: ~3/4 of physical VMEM, capped at 100 MiB.
    # (v5e/v6e: 128 MiB physical -> 96 MiB; v7x: 64 MiB per TensorCore -> 48 MiB.)
    try:
        cap = int(pltpu.get_tpu_info().vmem_capacity_bytes)
    except Exception:
        cap = 64 * 1024 * 1024
    return int(min(100 * 1024 * 1024, cap * 3 // 4))


def _const_spec(shape):
    """Grid-invariant full-array operand; single-buffered (fetched once)."""
    index_map = lambda g: (0,) * len(shape)
    try:
        return pl.BlockSpec(shape, index_map, pipeline_mode=pl.Buffered(1))
    except TypeError:  # older jax without pipeline_mode on BlockSpec
        return pl.BlockSpec(shape, index_map)


# ----------------------------------------------------------------------------
# Grouping (pointnet2 QueryAndGroup) -- data-dependent neighbor search + gather.
# TODO(synk): ball-query + gather is a sequential data-dependent gather kept in
# plain JAX; an in-kernel DMA gather (scalar-prefetch idx + make_async_copy
# double-buffering against the MLP matmuls) would remove one HBM round trip of
# the (G, S, C+3) tensor and is left for a follow-up.
# ----------------------------------------------------------------------------
def ball_query(radius, nsample, xyz, new_xyz):
    """Exact semantics of the pointnet2 ball_query CUDA kernel."""
    d2 = jnp.sum((new_xyz[:, :, None, :] - xyz[:, None, :, :]) ** 2, axis=-1)
    within = d2 < radius * radius                       # (B, J, N)
    cnt = jnp.cumsum(within.astype(jnp.int32), axis=-1)
    first_idx = jnp.argmax(within, axis=-1)             # (B, J)
    slots = []
    for s in range(nsample):
        hit = within & (cnt == s + 1)
        has = jnp.any(hit, axis=-1)
        slots.append(jnp.where(has, jnp.argmax(hit, axis=-1), first_idx))
    idx = jnp.stack(slots, axis=-1)
    has_any = jnp.any(within, axis=-1, keepdims=True)
    # Empty groups fall back to index 0 (same convention used by the reference).
    return jnp.where(has_any, idx, 0).astype(jnp.int32)


def group(points, idx):
    # points: (B, N, D), idx: (B, J, S) -> (B, J, S, D)
    B, N, D = points.shape
    _, J, S = idx.shape
    pts = jnp.broadcast_to(points[:, None, :, :], (B, J, N, D))
    return jnp.take_along_axis(pts, idx[..., None], axis=2)


# ----------------------------------------------------------------------------
# Pallas kernel: per-scale (1x1 conv MLP + ReLU) -> max-pool over samples ->
# fusion 1x1 conv + ReLU.  All lane widths are 128 (padded with zero columns,
# which stay zero through zero-padded weights/biases and ReLU).  Matmul inputs
# are bf16, accumulation is f32 on the MXU.
# ----------------------------------------------------------------------------
def make_desa_kernel(num_scales, n_hidden, off_l0, kin_pad, off_hidden,
                     off_fus, off_fus_nf, knf_pad, n_pad):
    bias_stride = 1 + n_hidden                 # bias-slab rows per scale
    fus_bias_row = num_scales * bias_stride

    def mm(x3, w):
        # (TG, S, K) @ (K, N) -> (TG, S, N).
        # Leading-dim merge/split: minor dim unchanged and S % 8 == 0, so these
        # reshapes are layout-preserving (no VMEM relayout copy); one bf16 MXU
        # matmul with f32 accumulation.
        tg, s, k = x3.shape
        y = jnp.dot(x3.reshape(tg * s, k), w, preferred_element_type=jnp.float32)
        return y.reshape(tg, s, w.shape[1])

    def kernel(*args):
        out_ref = args[-1]
        b_ref = args[-2]                       # packed bias slab (NB, n_pad) f32
        w_ref = args[-3]                       # packed weight slab (R, n_pad) bf16
        nf = args[0][...]                      # (TG, knf_pad) bf16 node features

        pooled = []
        # TODO(synk): block-diagonal lane packing of the per-scale weights (one
        # matmul per layer across all scales, 128/256-lane dense) is a further
        # MXU-side win left for a follow-up.
        for i in range(num_scales):
            x = args[1 + i][...]               # (TG, S, kin_pad) bf16 = [gf-nf | gx | 0]
            # layer 0: one matmul covers (gf-nf)@wf + gx@(wl/r); bias = bl+bf
            w0 = w_ref[off_l0[i]:off_l0[i] + kin_pad, :]
            b0 = b_ref[i * bias_stride:i * bias_stride + 1, :]
            h = jnp.maximum(mm(x, w0) + b0, 0.0)               # f32
            for j in range(n_hidden):
                o = off_hidden[i][j]
                w = w_ref[o:o + n_pad, :]
                b = b_ref[i * bias_stride + 1 + j:i * bias_stride + 2 + j, :]
                h = jnp.maximum(mm(h.astype(jnp.bfloat16), w) + b, 0.0)
            pooled.append(jnp.max(h, axis=1).astype(jnp.bfloat16))   # (TG, n_pad)

        # fusion 1x1 conv (+BN folded) + ReLU; output is lane-dense (n_pad = 128k)
        out = jnp.dot(nf, w_ref[off_fus_nf:off_fus_nf + knf_pad, :],
                      preferred_element_type=jnp.float32)
        for i in range(num_scales):
            out = out + jnp.dot(pooled[i], w_ref[off_fus[i]:off_fus[i] + n_pad, :],
                                preferred_element_type=jnp.float32)
        out = out + b_ref[fus_bias_row:fus_bias_row + 1, :]
        out_ref[...] = jnp.maximum(out, 0.0)

    return kernel


def desa_forward(pcl_feat, node_feat, pcl_xyz, node_xyz, params, radii, nsamples, mlp):
    B, J, C = node_feat.shape
    G = B * J
    num_scales = len(radii)
    n_hidden = len(mlp) - 1

    n_pad = _round_up(max(max(mlp), C), LANE)   # padded layer/output lane width
    kin = C + 3
    kin_pad = _round_up(kin, SUB)
    knf_pad = _round_up(C, SUB)

    # ---- tile policy -----------------------------------------------------
    # Always >= 2 tiles (DMA/compute overlap even at small G), even tile count
    # (v7x megacore sharding via the "parallel" axis), balanced TG (no
    # pathological zero-row padding), TG <= 256 (v7x VMEM headroom).
    ntiles = max(2, pl.cdiv(G, TG_CAP))
    ntiles += ntiles % 2
    TG = _round_up(pl.cdiv(G, ntiles), SUB)
    G_pad = ntiles * TG

    nf_flat = node_feat.reshape(G, C)
    xyz_all = jnp.concatenate([pcl_xyz, node_xyz], axis=1)
    feat_all = jnp.concatenate([pcl_feat, node_feat], axis=1)

    # ---- one packed weight slab (bf16): all 1x1 convs, BN + 1/r folded --------
    w_blocks, off = [], 0
    off_l0, off_hidden, off_fus = [], [], []
    d0 = mlp[0]
    for i in range(num_scales):
        p = params["scales"][i]
        w0 = np.zeros((kin_pad, n_pad), np.float32)
        w0[:C, :d0] = np.asarray(p["wf"])
        w0[C:C + 3, :d0] = np.asarray(p["wl"]) / float(radii[i])   # fold 1/r into wl
        off_l0.append(off); w_blocks.append(w0); off += kin_pad
        offs = []
        for (w, _) in p["layers"]:
            kin_l, kout_l = w.shape
            wp = np.zeros((n_pad, n_pad), np.float32)
            wp[:kin_l, :kout_l] = np.asarray(w)
            offs.append(off); w_blocks.append(wp); off += n_pad
        off_hidden.append(offs)
    d_last = mlp[-1]
    wfus = np.asarray(params["wfus"])                   # (C + d_last*scales, C)
    for i in range(num_scales):
        wp = np.zeros((n_pad, n_pad), np.float32)
        wp[:d_last, :C] = wfus[i * d_last:(i + 1) * d_last, :]
        off_fus.append(off); w_blocks.append(wp); off += n_pad
    wnf = np.zeros((knf_pad, n_pad), np.float32)
    wnf[:C, :C] = wfus[num_scales * d_last:, :]
    off_fus_nf = off; w_blocks.append(wnf); off += knf_pad
    w_slab = jnp.asarray(np.concatenate(w_blocks, axis=0), dtype=jnp.bfloat16)

    # ---- one packed bias slab (f32): per scale [bl+bf, hidden biases]; fusion -
    b_rows = []
    for i in range(num_scales):
        p = params["scales"][i]
        bp = np.zeros((1, n_pad), np.float32)
        bp[0, :d0] = np.asarray(p["bl"])[0] + np.asarray(p["bf"])[0]
        b_rows.append(bp)
        for (_, b) in p["layers"]:
            bp = np.zeros((1, n_pad), np.float32)
            bp[0, :b.shape[-1]] = np.asarray(b)[0]
            b_rows.append(bp)
    bp = np.zeros((1, n_pad), np.float32)
    bp[0, :C] = np.asarray(params["bfus"])[0]
    b_rows.append(bp)
    b_slab = jnp.asarray(np.concatenate(b_rows, axis=0))

    # ---- per-scale grouped inputs (centered in f32, stored bf16) ---------------
    nf_in = jnp.pad(nf_flat, ((0, G_pad - G), (0, knf_pad - C))).astype(jnp.bfloat16)
    kernel_inputs = [nf_in]
    in_specs = [pl.BlockSpec((TG, knf_pad), lambda g: (g, 0))]
    for i, (r, S) in enumerate(zip(radii, nsamples)):
        idx = ball_query(r, S, xyz_all, node_xyz)
        S_pad = _round_up(S, SUB)
        if S_pad != S:
            # duplicate slot 0 (ball_query's own fill convention) -> max-pool invariant
            idx = jnp.concatenate(
                [idx, jnp.broadcast_to(idx[..., :1], (B, J, S_pad - S))], axis=-1)
        gx = group(xyz_all, idx) - node_xyz[:, :, None, :]        # (B, J, S, 3)
        gf = group(feat_all, idx) - node_feat[:, :, None, :]      # centered in f32
        cat = jnp.concatenate([gf, gx], axis=-1).reshape(G, S_pad, kin)
        cat = jnp.pad(cat, ((0, G_pad - G), (0, 0), (0, kin_pad - kin)))
        kernel_inputs.append(cat.astype(jnp.bfloat16))
        in_specs.append(pl.BlockSpec((TG, S_pad, kin_pad), lambda g: (g, 0, 0)))

    kernel_inputs += [w_slab, b_slab]
    in_specs += [_const_spec(w_slab.shape), _const_spec(b_slab.shape)]

    kernel = make_desa_kernel(num_scales, n_hidden, tuple(off_l0), kin_pad,
                              tuple(tuple(o) for o in off_hidden),
                              tuple(off_fus), off_fus_nf, knf_pad, n_pad)

    out = pl.pallas_call(
        kernel,
        out_shape=jax.ShapeDtypeStruct((G_pad, n_pad), jnp.float32),
        grid=(ntiles,),
        in_specs=in_specs,
        out_specs=pl.BlockSpec((TG, n_pad), lambda g: (g, 0)),
        compiler_params=pltpu.CompilerParams(
            dimension_semantics=("parallel",),
            vmem_limit_bytes=_vmem_limit_bytes()),
    )(*kernel_inputs)
    return out[:G, :C].reshape(B, J, C)


# ----------------------------------------------------------------------------
# Deterministic parameter init (Conv2d/Conv1d weights + eval-mode BN folding).
# ----------------------------------------------------------------------------
def init_params(key, in_channel, mlp, scale_num):
    bn_scale = 1.0 / np.sqrt(1.0 + 1e-5)   # BN eval with default stats -> x / sqrt(1+eps)
    keys = iter(jax.random.split(key, 4 * scale_num * (len(mlp) + 2) + 8))

    def conv(kin, kout):
        w = jax.random.normal(next(keys), (kin, kout), jnp.float32) * (1.0 / np.sqrt(kin))
        b = jax.random.normal(next(keys), (1, kout), jnp.float32) * 0.01
        return w * bn_scale, b * bn_scale   # fold BatchNorm into the 1x1 conv

    scales = []
    for _ in range(scale_num):
        wl, bl = conv(3, mlp[0])
        wf, bf = conv(in_channel, mlp[0])
        layers = []
        last = mlp[0]
        for oc in mlp[1:]:
            layers.append(conv(last, oc))
            last = oc
        scales.append(dict(wl=wl, bl=bl, wf=wf, bf=bf, layers=layers))
    c_total = in_channel + mlp[-1] * scale_num
    wfus, bfus = conv(c_total, in_channel)
    return dict(scales=scales, wfus=wfus, bfus=bfus)


# ----------------------------------------------------------------------------
# Pure-JAX f32 reference (same math, used only to sanity-check the kernel).
# ----------------------------------------------------------------------------
def desa_ref(pcl_feat, node_feat, pcl_xyz, node_xyz, params, radii, nsamples):
    xyz_all = jnp.concatenate([pcl_xyz, node_xyz], axis=1)
    feat_all = jnp.concatenate([pcl_feat, node_feat], axis=1)
    hp = jax.lax.Precision.HIGHEST
    pooled = []
    for i, (r, S) in enumerate(zip(radii, nsamples)):
        idx = ball_query(r, S, xyz_all, node_xyz)
        gx = (group(xyz_all, idx) - node_xyz[:, :, None, :]) / r
        gf = group(feat_all, idx) - node_feat[:, :, None, :]
        p = params["scales"][i]
        h = (jnp.matmul(gx, p["wl"], precision=hp) + p["bl"]
             + jnp.matmul(gf, p["wf"], precision=hp) + p["bf"])
        h = jax.nn.relu(h)
        for (w, b) in p["layers"]:
            h = jax.nn.relu(jnp.matmul(h, w, precision=hp) + b)
        pooled.append(jnp.max(h, axis=2))
    cat = jnp.concatenate(pooled + [node_feat], axis=-1)
    return jax.nn.relu(jnp.matmul(cat, params["wfus"], precision=hp) + params["bfus"])


if __name__ == "__main__":
    B, N, J, C = 2, 64, 8, 32
    mlp = [32, 32, 64]
    radii = [0.2, 0.4]        # consistent (scale_num=2) choice for the synthetic module
    nsamples = [8, 8]

    key = jax.random.PRNGKey(0)
    k1, k2, k3, k4, kp = jax.random.split(key, 5)
    pcl_xyz = jax.random.uniform(k1, (B, N, 3), jnp.float32)
    node_xyz = jax.random.uniform(k2, (B, J, 3), jnp.float32)
    pcl_feat = jax.random.normal(k3, (B, N, C), jnp.float32)
    node_feat = jax.random.normal(k4, (B, J, C), jnp.float32)

    params = init_params(kp, C, mlp, len(radii))

    out = desa_forward(pcl_feat, node_feat, pcl_xyz, node_xyz, params, radii, nsamples, mlp)
    out = jax.block_until_ready(out)
    assert out.shape == (B, J, C)

    ref = desa_ref(pcl_feat, node_feat, pcl_xyz, node_xyz, params, radii, nsamples)
    # bf16 matmul inputs (f32 accumulation) -> looser tolerance than the pure-f32
    # variant (which used 5e-3); 4e-2 is ~2x the estimated worst-case bf16 error
    # for this 4-matmul-deep network and still catches any structural bug.
    np.testing.assert_allclose(np.asarray(out), np.asarray(ref), rtol=4e-2, atol=4e-2)

    print("KERNEL_OK")
</pallas_src>

<mosaic_0001>
module attributes {stable_mosaic.version = 11 : i64} {
  func.func @kernel(%arg0: i32, %arg1: memref<8x32xbf16, #tpu.memory_space<vmem>>, %arg2: memref<8x8x40xbf16, #tpu.memory_space<vmem>>, %arg3: memref<8x8x40xbf16, #tpu.memory_space<vmem>>, %arg4: memref<880x128xbf16, #tpu.memory_space<vmem>>, %arg5: memref<7x128xf32, #tpu.memory_space<vmem>>, %arg6: memref<8x128xf32, #tpu.memory_space<vmem>>) attributes {dimension_semantics = [#tpu.dimension_semantics<parallel>], iteration_bounds = array<i64: 2>, scalar_prefetch = 0 : i64, scratch_operands = 0 : i64, tpu.core_type = #tpu.core_type<tc>, window_params = [{transform_indices = @transform_0, window_bounds = array<i64: 8, 32>}, {transform_indices = @transform_1, window_bounds = array<i64: 8, 8, 40>}, {transform_indices = @transform_2, window_bounds = array<i64: 8, 8, 40>}, {pipeline_mode = #tpu.pipeline_mode<synchronous>, transform_indices = @transform_3, window_bounds = array<i64: 880, 128>}, {pipeline_mode = #tpu.pipeline_mode<synchronous>, transform_indices = @transform_4, window_bounds = array<i64: 7, 128>}, {transform_indices = @transform_5, window_bounds = array<i64: 8, 128>}]} {
    %c0 = arith.constant 0 : index
    %c0_0 = arith.constant 0 : index
    %0 = vector.load %arg1[%c0, %c0_0] : memref<8x32xbf16, #tpu.memory_space<vmem>>, vector<8x32xbf16>
    %c0_1 = arith.constant 0 : index
    %c0_2 = arith.constant 0 : index
    %c0_3 = arith.constant 0 : index
    %1 = vector.load %arg2[%c0_1, %c0_2, %c0_3] : memref<8x8x40xbf16, #tpu.memory_space<vmem>>, vector<8x8x40xbf16>
    %c0_4 = arith.constant 0 : index
    %c0_5 = arith.constant 0 : index
    %2 = vector.load %arg4[%c0_4, %c0_5] : memref<880x128xbf16, #tpu.memory_space<vmem>>, vector<40x128xbf16>
    %c0_6 = arith.constant 0 : index
    %c0_7 = arith.constant 0 : index
    %3 = vector.load %arg5[%c0_6, %c0_7] : memref<7x128xf32, #tpu.memory_space<vmem>>, vector<1x128xf32>
    %4 = vector.shape_cast %1 : vector<8x8x40xbf16> to vector<64x40xbf16>
    %cst = arith.constant dense<0.000000e+00> : vector<64x128xf32>
    %5 = tpu.matmul %4, %2, %cst {dimension_numbers = #tpu.dot_dimension_numbers<[1], [0], [0], [1], [0, 0, 1, 1], [], []>} : vector<64x40xbf16>, vector<40x128xbf16>, vector<64x128xf32> -> vector<64x128xf32>
    %6 = vector.shape_cast %5 : vector<64x128xf32> to vector<8x8x128xf32>
    %7 = vector.shape_cast %3 : vector<1x128xf32> to vector<1x1x128xf32>
    %8 = vector.broadcast %7 : vector<1x1x128xf32> to vector<8x8x128xf32>
    %9 = arith.addf %6, %8 : vector<8x8x128xf32>
    %cst_8 = arith.constant 0.000000e+00 : f32
    %10 = vector.broadcast %cst_8 : f32 to vector<8x8x128xf32>
    %11 = arith.maximumf %9, %10 : vector<8x8x128xf32>
    %c40 = arith.constant 40 : index
    %c0_9 = arith.constant 0 : index
    %12 = vector.load %arg4[%c40, %c0_9] : memref<880x128xbf16, #tpu.memory_space<vmem>>, vector<128x128xbf16>
    %c1 = arith.constant 1 : index
    %c0_10 = arith.constant 0 : index
    %13 = vector.load %arg5[%c1, %c0_10] : memref<7x128xf32, #tpu.memory_space<vmem>>, vector<1x128xf32>
    %14 = arith.truncf %11 : vector<8x8x128xf32> to vector<8x8x128xbf16>
    %15 = vector.shape_cast %14 : vector<8x8x128xbf16> to vector<64x128xbf16>
    %cst_11 = arith.constant dense<0.000000e+00> : vector<64x128xf32>
    %16 = tpu.matmul %15, %12, %cst_11 {dimension_numbers = #tpu.dot_dimension_numbers<[1], [0], [0], [1], [0, 0, 1, 1], [], []>} : vector<64x128xbf16>, vector<128x128xbf16>, vector<64x128xf32> -> vector<64x128xf32>
    %17 = vector.shape_cast %16 : vector<64x128xf32> to vector<8x8x128xf32>
    %18 = vector.shape_cast %13 : vector<1x128xf32> to vector<1x1x128xf32>
    %19 = vector.broadcast %18 : vector<1x1x128xf32> to vector<8x8x128xf32>
    %20 = arith.addf %17, %19 : vector<8x8x128xf32>
    %cst_12 = arith.constant 0.000000e+00 : f32
    %21 = vector.broadcast %cst_12 : f32 to vector<8x8x128xf32>
    %22 = arith.maximumf %20, %21 : vector<8x8x128xf32>
    %c168 = arith.constant 168 : index
    %c0_13 = arith.constant 0 : index
    %23 = vector.load %arg4[%c168, %c0_13] : memref<880x128xbf16, #tpu.memory_space<vmem>>, vector<128x128xbf16>
    %c2 = arith.constant 2 : index
    %c0_14 = arith.constant 0 : index
    %24 = vector.load %arg5[%c2, %c0_14] : memref<7x128xf32, #tpu.memory_space<vmem>>, vector<1x128xf32>
    %25 = arith.truncf %22 : vector<8x8x128xf32> to vector<8x8x128xbf16>
    %26 = vector.shape_cast %25 : vector<8x8x128xbf16> to vector<64x128xbf16>
    %cst_15 = arith.constant dense<0.000000e+00> : vector<64x128xf32>
    %27 = tpu.matmul %26, %23, %cst_15 {dimension_numbers = #tpu.dot_dimension_numbers<[1], [0], [0], [1], [0, 0, 1, 1], [], []>} : vector<64x128xbf16>, vector<128x128xbf16>, vector<64x128xf32> -> vector<64x128xf32>
    %28 = vector.shape_cast %27 : vector<64x128xf32> to vector<8x8x128xf32>
    %29 = vector.shape_cast %24 : vector<1x128xf32> to vector<1x1x128xf32>
    %30 = vector.broadcast %29 : vector<1x1x128xf32> to vector<8x8x128xf32>
    %31 = arith.addf %28, %30 : vector<8x8x128xf32>
    %cst_16 = arith.constant 0.000000e+00 : f32
    %32 = vector.broadcast %cst_16 : f32 to vector<8x8x128xf32>
    %33 = arith.maximumf %31, %32 : vector<8x8x128xf32>
    %cst_17 = arith.constant dense<0xFF800000> : vector<8x128xf32>
    %34 = vector.multi_reduction <maximumf>, %33, %cst_17 [1] : vector<8x8x128xf32> to vector<8x128xf32>
    %35 = arith.truncf %34 : vector<8x128xf32> to vector<8x128xbf16>
    %c0_18 = arith.constant 0 : index
    %c0_19 = arith.constant 0 : index
    %c0_20 = arith.constant 0 : index
    %36 = vector.load %arg3[%c0_18, %c0_19, %c0_20] : memref<8x8x40xbf16, #tpu.memory_space<vmem>>, vector<8x8x40xbf16>
    %c296 = arith.constant 296 : index
    %c0_21 = arith.constant 0 : index
    %37 = vector.load %arg4[%c296, %c0_21] : memref<880x128xbf16, #tpu.memory_space<vmem>>, vector<40x128xbf16>
    %c3 = arith.constant 3 : index
    %c0_22 = arith.constant 0 : index
    %38 = vector.load %arg5[%c3, %c0_22] : memref<7x128xf32, #tpu.memory_space<vmem>>, vector<1x128xf32>
    %39 = vector.shape_cast %36 : vector<8x8x40xbf16> to vector<64x40xbf16>
    %cst_23 = arith.constant dense<0.000000e+00> : vector<64x128xf32>
    %40 = tpu.matmul %39, %37, %cst_23 {dimension_numbers = #tpu.dot_dimension_numbers<[1], [0], [0], [1], [0, 0, 1, 1], [], []>} : vector<64x40xbf16>, vector<40x128xbf16>, vector<64x128xf32> -> vector<64x128xf32>
    %41 = vector.shape_cast %40 : vector<64x128xf32> to vector<8x8x128xf32>
    %42 = vector.shape_cast %38 : vector<1x128xf32> to vector<1x1x128xf32>
    %43 = vector.broadcast %42 : vector<1x1x128xf32> to vector<8x8x128xf32>
    %44 = arith.addf %41, %43 : vector<8x8x128xf32>
    %cst_24 = arith.constant 0.000000e+00 : f32
    %45 = vector.broadcast %cst_24 : f32 to vector<8x8x128xf32>
    %46 = arith.maximumf %44, %45 : vector<8x8x128xf32>
    %c336 = arith.constant 336 : index
    %c0_25 = arith.constant 0 : index
    %47 = vector.load %arg4[%c336, %c0_25] : memref<880x128xbf16, #tpu.memory_space<vmem>>, vector<128x128xbf16>
    %c4 = arith.constant 4 : index
    %c0_26 = arith.constant 0 : index
    %48 = vector.load %arg5[%c4, %c0_26] : memref<7x128xf32, #tpu.memory_space<vmem>>, vector<1x128xf32>
    %49 = arith.truncf %46 : vector<8x8x128xf32> to vector<8x8x128xbf16>
    %50 = vector.shape_cast %49 : vector<8x8x128xbf16> to vector<64x128xbf16>
    %cst_27 = arith.constant dense<0.000000e+00> : vector<64x128xf32>
    %51 = tpu.matmul %50, %47, %cst_27 {dimension_numbers = #tpu.dot_dimension_numbers<[1], [0], [0], [1], [0, 0, 1, 1], [], []>} : vector<64x128xbf16>, vector<128x128xbf16>, vector<64x128xf32> -> vector<64x128xf32>
    %52 = vector.shape_cast %51 : vector<64x128xf32> to vector<8x8x128xf32>
    %53 = vector.shape_cast %48 : vector<1x128xf32> to vector<1x1x128xf32>
    %54 = vector.broadcast %53 : vector<1x1x128xf32> to vector<8x8x128xf32>
    %55 = arith.addf %52, %54 : vector<8x8x128xf32>
    %cst_28 = arith.constant 0.000000e+00 : f32
    %56 = vector.broadcast %cst_28 : f32 to vector<8x8x128xf32>
    %57 = arith.maximumf %55, %56 : vector<8x8x128xf32>
    %c464 = arith.constant 464 : index
    %c0_29 = arith.constant 0 : index
    %58 = vector.load %arg4[%c464, %c0_29] : memref<880x128xbf16, #tpu.memory_space<vmem>>, vector<128x128xbf16>
    %c5 = arith.constant 5 : index
    %c0_30 = arith.constant 0 : index
    %59 = vector.load %arg5[%c5, %c0_30] : memref<7x128xf32, #tpu.memory_space<vmem>>, vector<1x128xf32>
    %60 = arith.truncf %57 : vector<8x8x128xf32> to vector<8x8x128xbf16>
    %61 = vector.shape_cast %60 : vector<8x8x128xbf16> to vector<64x128xbf16>
    %cst_31 = arith.constant dense<0.000000e+00> : vector<64x128xf32>
    %62 = tpu.matmul %61, %58, %cst_31 {dimension_numbers = #tpu.dot_dimension_numbers<[1], [0], [0], [1], [0, 0, 1, 1], [], []>} : vector<64x128xbf16>, vector<128x128xbf16>, vector<64x128xf32> -> vector<64x128xf32>
    %63 = vector.shape_cast %62 : vector<64x128xf32> to vector<8x8x128xf32>
    %64 = vector.shape_cast %59 : vector<1x128xf32> to vector<1x1x128xf32>
    %65 = vector.broadcast %64 : vector<1x1x128xf32> to vector<8x8x128xf32>
    %66 = arith.addf %63, %65 : vector<8x8x128xf32>
    %cst_32 = arith.constant 0.000000e+00 : f32
    %67 = vector.broadcast %cst_32 : f32 to vector<8x8x128xf32>
    %68 = arith.maximumf %66, %67 : vector<8x8x128xf32>
    %cst_33 = arith.constant dense<0xFF800000> : vector<8x128xf32>
    %69 = vector.multi_reduction <maximumf>, %68, %cst_33 [1] : vector<8x8x128xf32> to vector<8x128xf32>
    %70 = arith.truncf %69 : vector<8x128xf32> to vector<8x128xbf16>
    %c848 = arith.constant 848 : index
    %c0_34 = arith.constant 0 : index
    %71 = vector.load %arg4[%c848, %c0_34] : memref<880x128xbf16, #tpu.memory_space<vmem>>, vector<32x128xbf16>
    %cst_35 = arith.constant dense<0.000000e+00> : vector<8x128xf32>
    %72 = tpu.matmul %0, %71, %cst_35 {dimension_numbers = #tpu.dot_dimension_numbers<[1], [0], [0], [1], [0, 0, 1, 1], [], []>} : vector<8x32xbf16>, vector<32x128xbf16>, vector<8x128xf32> -> vector<8x128xf32>
    %c592 = arith.constant 592 : index
    %c0_36 = arith.constant 0 : index
    %73 = vector.load %arg4[%c592, %c0_36] : memref<880x128xbf16, #tpu.memory_space<vmem>>, vector<128x128xbf16>
    %cst_37 = arith.constant dense<0.000000e+00> : vector<8x128xf32>
    %74 = tpu.matmul %35, %73, %cst_37 {dimension_numbers = #tpu.dot_dimension_numbers<[1], [0], [0], [1], [0, 0, 1, 1], [], []>} : vector<8x128xbf16>, vector<128x128xbf16>, vector<8x128xf32> -> vector<8x128xf32>
    %75 = arith.addf %72, %74 : vector<8x128xf32>
    %c720 = arith.constant 720 : index
    %c0_38 = arith.constant 0 : index
    %76 = vector.load %arg4[%c720, %c0_38] : memref<880x128xbf16, #tpu.memory_space<vmem>>, vector<128x128xbf16>
    %cst_39 = arith.constant dense<0.000000e+00> : vector<8x128xf32>
    %77 = tpu.matmul %70, %76, %cst_39 {dimension_numbers = #tpu.dot_dimension_numbers<[1], [0], [0], [1], [0, 0, 1, 1], [], []>} : vector<8x128xbf16>, vector<128x128xbf16>, vector<8x128xf32> -> vector<8x128xf32>
    %78 = arith.addf %75, %77 : vector<8x128xf32>
    %c6 = arith.constant 6 : index
    %c0_40 = arith.constant 0 : index
    %79 = vector.load %arg5[%c6, %c0_40] : memref<7x128xf32, #tpu.memory_space<vmem>>, vector<1x128xf32>
    %80 = vector.broadcast %79 : vector<1x128xf32> to vector<8x128xf32>
    %81 = arith.addf %78, %80 : vector<8x128xf32>
    %cst_41 = arith.constant 0.000000e+00 : f32
    %82 = vector.broadcast %cst_41 : f32 to vector<8x128xf32>
    %83 = arith.maximumf %81, %82 : vector<8x128xf32>
    %c0_42 = arith.constant 0 : index
    %c0_43 = arith.constant 0 : index
    %84 = vector.load %arg6[%c0_42, %c0_43] : memref<8x128xf32, #tpu.memory_space<vmem>>, vector<8x128xf32>
    tpu.vector_store %arg6[%c0_42, %c0_43], %83 {strides = array<i32>} : memref<8x128xf32, #tpu.memory_space<vmem>>, vector<8x128xf32>,
    return
  }
  func.func @transform_0(%arg0: i32) -> (i32, i32) {
    %c0_i32 = arith.constant 0 : i32
    %c0_i32_0 = arith.constant 0 : i32
    return %arg0, %c0_i32 : i32, i32
  }
  func.func @transform_1(%arg0: i32) -> (i32, i32, i32) {
    %c0_i32 = arith.constant 0 : i32
    %c0_i32_0 = arith.constant 0 : i32
    %c0_i32_1 = arith.constant 0 : i32
    return %arg0, %c0_i32, %c0_i32_0 : i32, i32, i32
  }
  func.func @transform_2(%arg0: i32) -> (i32, i32, i32) {
    %c0_i32 = arith.constant 0 : i32
    %c0_i32_0 = arith.constant 0 : i32
    %c0_i32_1 = arith.constant 0 : i32
    return %arg0, %c0_i32, %c0_i32_0 : i32, i32, i32
  }
  func.func @transform_3(%arg0: i32) -> (i32, i32) {
    %c0_i32 = arith.constant 0 : i32
    %c0_i32_0 = arith.constant 0 : i32
    %c0_i32_1 = arith.constant 0 : i32
    return %c0_i32, %c0_i32_0 : i32, i32
  }
  func.func @transform_4(%arg0: i32) -> (i32, i32) {
    %c0_i32 = arith.constant 0 : i32
    %c0_i32_0 = arith.constant 0 : i32
    %c0_i32_1 = arith.constant 0 : i32
    return %c0_i32, %c0_i32_0 : i32, i32
  }
  func.func @transform_5(%arg0: i32) -> (i32, i32) {
    %c0_i32 = arith.constant 0 : i32
    %c0_i32_0 = arith.constant 0 : i32
    return %arg0, %c0_i32 : i32, i32
  }
}

</mosaic_0001>

<bundles_post_ra>
// kernel: tpu_custom_call.1
= control target key start
LH: loop header
LB: loop body
LE: loop exit
PB: predicated region body
PF: predicated region fallthrough
CT: control target
= control target key end

     0   :  { %s3083_s0 = inlined_call_operand.hbm [shape: bf16[16,32], index: 0, kind: input, shape index: {}]   ;;  %s3084_s1 = inlined_call_operand.hbm [shape: bf16[16,8,40], index: 1, kind: input, shape index: {}]   ;;  %s3085_s2 = inlined_call_operand.hbm [shape: bf16[16,8,40], index: 2, kind: input, shape index: {}]   ;;  %s3086_s3 = inlined_call_operand.hbm [shape: bf16[880,128], index: 3, kind: input, shape index: {}]   ;;  %s3087_s4 = inlined_call_operand.vmem [shape: f32[7,128], index: 4, kind: input, shape index: {}]   ;;  %s3088_s5 = inlined_call_operand.hbm [shape: f32[16,128], index: 5, kind: output, shape index: {}]  }
   0x1   :  { %3107 = sst [smem:[#allocation20_spill]] %s3084_s1 }
   0x2   :  { %10 = vsyncpa [#allocation3], 0 }
   0x3   :  { %12 = vsyncpa [#allocation3 + $0x1], 0 }
   0x4   :  { %13 = vsyncpa [#allocation6], 0 }
   0x5   :  { %15 = vsyncpa [#allocation6 + $0x1], 0 }
   0x6   :  { %16 = vsyncpa [#allocation9], 0 }
   0x7   :  { %17 = vsyncpa [#allocation4], 0 }
   0x8   :  { %19 = vsyncpa [#allocation4 + $0x1], 0  ;;  %s2708_s18 = smov 0   ;;  %s2710_s19 = smov 0  }
   0x9   :  { %s2712_s20 = smov 0   ;;  %s2714_s21 = smov 0  }
   0xa LB: > { %3108 = sst [smem:[#allocation15_spill]] %s2663_s20  ;;  %s2729_s22 = sadd.s32 1, %s2667_s21   ;;  %s2667_s21 = sphi %s2714_s21, %s3135_s21   ;;  %s2663_s20 = sphi %s2712_s20, %s3137_s20   ;;  %s2659_s19 = sphi %s2710_s19, %s3139_s19   ;;  %s2655_s18 = sphi %s2708_s18, %s3138_s18  }
   0xb   : > { %3109 = sst [smem:[#allocation16_spill]] %s2667_s21  ;;  %s32_s23 = sadd.s32 1, %s2663_s20 }
   0xc   : > { %3110 = sst [smem:[#allocation17_spill]] %s2729_s22  ;;  %s29_s24 = ssub.s32 %s2667_s21, %s2729_s22 }
   0xd   : > { %p3089_p0 = scmp.ne.s32.totalorder %s2663_s20, %s2659_s19  ;;  %p30_p1 = scmp.eq.s32.totalorder %s29_s24, 0 }
   0xe   : > { %p40_p2 = scmp.eq.s32.totalorder %s2667_s21, 0  ;;  %p2371_p5 = scmp.lt.s32.totalorder %s2667_s21, 2 }
   0xf   : > { %s2738_s25 = scalar_select %p30_p1, %s2663_s20, %s32_s23  }
  0x10   : > { %p41_p3 = por %p40_p2, %p3089_p0  ;;  %s2746_s26 = sand.u32 1, %s2663_s20  }
  0x11   : > { %3111 = sst [smem:[#allocation18_spill]] %s2738_s25  ;;  %s223_s27 = sand.u32 1, %s2667_s21  }
  0x12   : > { %s1953_s28 = sshll.u32 %s2746_s26, 5  ;;  %p2750_p6 = pnand %p2371_p5, %p41_p3 }
  0x13   : > { %s2065_s30 = sshll.u32 %s2667_s21, 9  ;;  %s3113_s1 = sld [smem:[#allocation20_spill]] }
  0x14   : > { %s3112_s29 = scalar_select %p2750_p6, 1, 0 }
  0x15   : > { %s227_s9 = scalar_lea.vmem [#allocation5], %s1953_s28  ;;  %s2766_s11 = scalar_lea.sflag [#allocation6], %s223_s27 }
  0x16   : > { %s234_s10 = sshll.u32 %s227_s9, 4  ;;  %p2772_p8 = pneg %p2750_p6  ;;  %s2764_s10 = int_to_ptr.vmem [resolvable:$true] %s234_s10 }
  0x18   : > { %s3114_s13 = scalar_select %p2772_p8, 1, 0 }
  0x19   : > { %s2760_s8 = scalar_lea.hbm %s3113_s1, %s2065_s30  ;;  %s2480_s16 = scalar_lea.hbm %s3113_s1, 1024 }
  0x1a   : > { %s2475_s12 = scalar_lea.hbm %s2760_s8, 512  ;;  %p2481_p11 = scmp.lt.u32.totalorder %s2760_s8, %s3113_s1 }
  0x1b   : > { %p2476_p7 = scmp.ne.s32.totalorder %s2760_s8, %s2475_s12  ;;  %p2482_p12 = scmp.lt.u32.totalorder %s2480_s16, %s2475_s12 }
  0x1c   : > { %p2484_p1 = scmp.lt.u32.totalorder %s2475_s12, %s2760_s8 }
  0x1d   : > { %p2478_p9 = pnand %p2772_p8, %p2476_p7  ;;  %p2483_p13 = por %p2482_p12, %p2481_p11 }
  0x1f   : > { %p2479_p10 = pneg %p2478_p9  ;;  %p2485_p2 = por %p2484_p1, %p2483_p13 }
  0x21   : > { %p2486_p3 = pnand %p2485_p2, %p2479_p10 }
  0x23   : > { %2489 = shalt.err (!%p2486_p3)
}
  0x24   : > { %s2490_s24 = scalar_lea.vmem %s2764_s10, 512  ;;  %s2669_s27 = smov [#allocation5]  }
  0x25   : > { %p2491_p5 = scmp.ne.s32.totalorder %s2764_s10, %s2490_s24  ;;  %s2495_s6 = sshll.u32 %s2669_s27, 4  ;;  %s2496_s6 = int_to_ptr.vmem [resolvable:$false] %s2495_s6 }
  0x26   : > { %s2497_s7 = scalar_lea.vmem %s2496_s6, 1024  ;;  %p2498_p4 = scmp.lt.s32.totalorder %s2764_s10, %s2496_s6 }
  0x27   : > { %p2493_p7 = pnand %p2491_p5, %p2772_p8  ;;  %p2499_p0 = scmp.lt.s32.totalorder %s2497_s7, %s2490_s24 }
  0x29   : > { %p2494_p9 = pneg %p2493_p7  ;;  %p2500_p11 = por %p2499_p0, %p2498_p4 }
  0x2b   : > { %p2501_p12 = pnand %p2500_p11, %p2494_p9 }
  0x2d   : > { %2504 = shalt.err (!%p2501_p12)
}
  0x2e   : > { %s3090_s9 = smov 64   ;;  %s3092_s12 = smov 4  }
  0x2f   : > { %2362 = dma.hbm_to_vmem [thread:$0]  (!%p2750_p6), %s2760_s8, 512, %s2764_s10, %s2766_s11, %s3090_s9, %s3090_s9, %s3092_s12  }
  0x30   : > { %s2804_s16 = scalar_lea.hbm %s3085_s2, %s2065_s30  ;;  %s2807_s17 = sadd.s32 4294967295, %s2667_s21  }
  0x31   : > { %s1947_s23 = sadd.s32 4294967294, %s2667_s21   ;;  %p45_p0 = scmp.ne.s32.totalorder %s2659_s19, %s2655_s18 }
  0x32   : > { %p3097_p4 = scmp.eq.s32.totalorder %s2807_s17, 0  ;;  %p163_p10 = scmp.eq.s32.totalorder %s2807_s17, 1 }
  0x33   : > { %p169_p13 = scmp.eq.s32.totalorder %s1947_s23, 1  ;;  %p1948_p2 = scmp.ge.s32.totalorder %s2667_s21, 1 }
  0x34   : > { %p2816_p1 = por %p3097_p4, %p45_p0  ;;  %p3116_p3 = scmp.ne.s32.totalorder %s2663_s20, %s2659_s19 }
  0x35   : > { %p2828_p7 = por %p169_p13, %p45_p0  ;;  %p176_p9 = scmp.lt.s32.totalorder %s2667_s21, 3 }
  0x36   : > { %s3115_s8 = scalar_select %p2816_p1, 1, 0 }
  0x37   : > { %p2824_p5 = por %p163_p10, %p3116_p3  ;;  %s248_s24 = scalar_lea.vmem [#allocation7], %s1953_s28 }
  0x38   : > { %s3118_s10 = scalar_select %p2828_p7, 1, 0 }
  0x39   : > { %s3117_s30 = scalar_select %p2824_p5, 1, 0 }
  0x3a   : > { %3119 = sst [smem:[#allocation19_spill]] %s3118_s10  ;;  %s255_s27 = sshll.u32 %s248_s24, 4  ;;  %s2856_s27 = int_to_ptr.vmem [resolvable:$true] %s255_s27 }
  0x3b   : > { %p2835_p11 = pnand %p1948_p2, %p176_p9  ;;  %s2672_s7 = smov [#allocation8]  }
  0x3c   : > { %s188_s14 = sshll.u32 %s2672_s7, 4  ;;  %s1951_s15 = sshll.u32 %s2746_s26, 2  ;;  %s189_s14 = int_to_ptr.vmem [resolvable:$true] %s188_s14 }
  0x3d   : > { %s3120_s6 = scalar_select %p2835_p11, 1, 0 }
  0x3e   : > { %p2352_p12 = pneg %p2835_p11  ;;  %s1952_s23 = sshll.u32 %s2667_s21, 6 }
  0x3f   : > { %s209_s9 = scalar_lea.vmem [#allocation2], %s1951_s15  ;;  %s2852_s25 = scalar_lea.hbm %s3083_s0, %s1952_s23 }
  0x40   : > { %s216_s12 = sshll.u32 %s209_s9, 4  ;;  %p2845_p0 = pnand %p2352_p12, %p3097_p4  ;;  %s2854_s12 = int_to_ptr.vmem [resolvable:$true] %s216_s12 }
  0x41   : > { %s2505_s9 = scalar_lea.hbm %s3086_s3, 7040 }
  0x42   : > { %p2506_p10 = scmp.ne.s32.totalorder %s3086_s3, %s2505_s9  ;;  %p2507_p13 = pneg %p2845_p0 }
  0x43   : > { %p2512_p9 = scmp.lt.u32.totalorder %s2505_s9, %s3086_s3 }
  0x44   : > { %p2508_p2 = pnand %p2507_p13, %p2506_p10 }
  0x46   : > { %p2509_p3 = pneg %p2508_p2 }
  0x48   : > { %p2514_p12 = pnand %p2512_p9, %p2509_p3 }
  0x4a   : > { %2517 = shalt.err (!%p2514_p12)
}
  0x4b   : > { %s2518_s23 = scalar_lea.vmem %s189_s14, 7040  ;;  %p2526_p1 = scmp.lt.s32.totalorder %s189_s14, %s189_s14 }
  0x4c   : > { %p2519_p4 = scmp.ne.s32.totalorder %s189_s14, %s2518_s23  ;;  %p2527_p11 = scmp.lt.s32.totalorder %s2518_s23, %s2518_s23 }
  0x4e   : > { %p2521_p7 = pnand %p2519_p4, %p2507_p13  ;;  %p2528_p6 = por %p2527_p11, %p2526_p1 }
  0x50   : > { %p2522_p5 = pneg %p2521_p7 }
  0x52   : > { %p2529_p8 = pnand %p2528_p6, %p2522_p5 }
  0x54   : > { %2532 = shalt.err (!%p2529_p8)
}
  0x55   : > { %s3122_s20 = smov 4   ;;  %s3123_s22 = smov 64  }
  0x56   : > { %2355 = dma.hbm_to_vmem [thread:$0]  (!%p2845_p0), %s3086_s3, 7040, %s189_s14, [#allocation9], %s3123_s22, %s3123_s22, %s3122_s20  }
  0x57   : > { %s206_s9 = scalar_lea.sflag [#allocation3], %s2746_s26  ;;  %s2533_s28 = scalar_lea.hbm %s2852_s25, 64 }
  0x58   : > { %p2534_p4 = scmp.ne.s32.totalorder %s2852_s25, %s2533_s28  ;;  %p3124_p6 = scmp.ne.s32.totalorder %s3114_s13, 0 }
  0x59   : > { %s2538_s23 = scalar_lea.hbm %s3083_s0, 128  ;;  %p2539_p5 = scmp.lt.u32.totalorder %s2852_s25, %s3083_s0 }
  0x5a   : > { %p2536_p8 = pnand %p2534_p4, %p3124_p6  ;;  %p2540_p7 = scmp.lt.u32.totalorder %s2538_s23, %s2533_s28 }
  0x5b   : > { %p2542_p10 = scmp.lt.u32.totalorder %s2533_s28, %s2852_s25 }
  0x5c   : > { %p2537_p1 = pneg %p2536_p8  ;;  %p2541_p11 = por %p2540_p7, %p2539_p5 }
  0x5e   : > { %p2543_p13 = por %p2542_p10, %p2541_p11 }
  0x60   : > { %p2544_p2 = pnand %p2543_p13, %p2537_p1 }
  0x62   : > { %2547 = shalt.err (!%p2544_p2)
}
  0x63   : > { %s2548_s26 = scalar_lea.vmem %s2854_s12, 64  ;;  %s2673_s14 = smov [#allocation2]  }
  0x64   : > { %p2549_p0 = scmp.ne.s32.totalorder %s2854_s12, %s2548_s26  ;;  %s2553_s7 = sshll.u32 %s2673_s14, 4  ;;  %s2554_s7 = int_to_ptr.vmem [resolvable:$false] %s2553_s7 }
  0x65   : > { %s2555_s21 = scalar_lea.vmem %s2554_s7, 128  ;;  %p2556_p12 = scmp.lt.s32.totalorder %s2854_s12, %s2554_s7 }
  0x66   : > { %p2551_p3 = pnand %p2549_p0, %p3124_p6  ;;  %p2557_p4 = scmp.lt.s32.totalorder %s2555_s21, %s2548_s26 }
  0x68   : > { %p2552_p9 = pneg %p2551_p3  ;;  %p2558_p8 = por %p2557_p4, %p2556_p12 }
  0x6a   : > { %p2559_p5 = pnand %p2558_p8, %p2552_p9 }
  0x6c   : > { %2562 = shalt.err (!%p2559_p5)
}
  0x6d   : > { %p3125_p1 = scmp.ne.s32.totalorder %s3112_s29, 0  ;;  %s2563_s10 = scalar_lea.hbm %s2804_s16, 512 }
  0x6e   : > { %p2564_p7 = scmp.ne.s32.totalorder %s2804_s16, %s2563_s10  ;;  %s2568_s1 = scalar_lea.hbm %s3085_s2, 1024 }
  0x6f   : > { %2359 = dma.hbm_to_vmem [thread:$0]  (!%p3125_p1), %s2852_s25, 64, %s2854_s12, %s206_s9  }
  0x70   : > { %p2566_p11 = pnand %p2564_p7, %p3124_p6  ;;  %p2569_p13 = scmp.lt.u32.totalorder %s2804_s16, %s3085_s2 }
  0x71   : > { %p2570_p2 = scmp.lt.u32.totalorder %s2568_s1, %s2563_s10  ;;  %p2572_p3 = scmp.lt.u32.totalorder %s2563_s10, %s2804_s16 }
  0x72   : > { %p2567_p10 = pneg %p2566_p11 }
  0x73   : > { %p2571_p0 = por %p2570_p2, %p2569_p13 }
  0x75   : > { %p2573_p9 = por %p2572_p3, %p2571_p0 }
  0x77   : > { %p2574_p12 = pnand %p2573_p9, %p2567_p10 }
  0x79   : > { %2577 = shalt.err (!%p2574_p12)
}
  0x7a   : > { %s2578_s25 = scalar_lea.vmem %s2856_s27, 512  ;;  %s2674_s12 = smov [#allocation7]  }
  0x7b   : > { %p2579_p4 = scmp.ne.s32.totalorder %s2856_s27, %s2578_s25  ;;  %s2583_s9 = sshll.u32 %s2674_s12, 4  ;;  %s2584_s9 = int_to_ptr.vmem [resolvable:$false] %s2583_s9 }
  0x7c   : > { %s2585_s26 = scalar_lea.vmem %s2584_s9, 1024  ;;  %p2586_p7 = scmp.lt.s32.totalorder %s2856_s27, %s2584_s9 }
  0x7d   : > { %p2581_p8 = pnand %p2579_p4, %p3124_p6  ;;  %p2587_p11 = scmp.lt.s32.totalorder %s2585_s26, %s2578_s25 }
  0x7f   : > { %p2582_p5 = pneg %p2581_p8  ;;  %p2588_p13 = por %p2587_p11, %p2586_p7 }
  0x81   : > { %p2589_p2 = pnand %p2588_p13, %p2582_p5 }
  0x83   : > { %2592 = shalt.err (!%p2589_p2)
}
  0x84   : > { %2365 = dma.hbm_to_vmem [thread:$0]  (!%p3125_p1), %s2804_s16, 512, %s2856_s27, %s2766_s11, %s3123_s22, %s3123_s22, %s3122_s20  }
  0x85   : > { %p3126_p6 = scmp.ne.s32.totalorder %s3120_s6, 0 }
  0x86   : > { %s2927_s13 = sand.u32 (!%p3126_p6), 1, %s2659_s19   ;;  %p3127_p10 = scmp.ne.s32.totalorder (!%p3126_p6), %s3115_s8, 0 }
  0x87   : > { %267 = sbr.rel (%p3126_p6) target bundleno = 1340 (0x53c), region = 40  ;;  %s1960_s14 = sshll.u32 (!%p3126_p6), %s2927_s13, 2 }
  0x88   : > { %s270_s7 = scalar_lea.sflag (!%p3126_p6), [#allocation3], %s2927_s13  ;;  %s2931_s21 = scalar_lea.vmem (!%p3126_p6), [#allocation2], %s1960_s14 }
  0x8e   : > { %2638 = dma.done.wait (%p3127_p10), %s270_s7, 64  }
  0x8f   : > { %2640 = vsyncadd (%p3127_p10), %s270_s7, 4294967232  ;;  %s278_s29 = sand.u32 1, %s2807_s17   ;;  %s1961_s11 = sshll.u32 %s2927_s13, 5 }
  0x90   : > { %s279_s16 = scalar_lea.sflag [#allocation6], %s278_s29  ;;  %s2939_s27 = scalar_lea.vmem [#allocation5], %s1961_s11 }
  0x91   : > { %2642 = dma.done.wait (%p3127_p10), %s279_s16, 1024  }
  0x92   : > { %2644 = vsyncadd (%p3127_p10), %s279_s16, 4294966272  ;;  %s2945_s6 = scalar_lea.vmem [#allocation7], %s1961_s11  ;;  %p3128_p1 = scmp.eq.s32.totalorder %s2807_s17, 0 }
  0x94   : > { %2646 = dma.done.wait (%p3128_p1), [#allocation9], 7040   ;;  %p3129_p0 = pmov %p3128_p1 }
  0x95   : > { %v2411_v0 = vld [vmem:[#allocation8] sm:$0xff]   ;;  %v2412_v1 = vld [vmem:[#allocation8 + $0x8] sm:$0xff]   ;;  %vm385_vm0 = vcmask 326656   ;;  %v2413_v3 = vld [vmem:[#allocation8 + $0x10] ss:$0 sps:$4 sm:$0xff]   ;;  %vm398_vm1 = vcmask 1043456  }
  0x96   : > { %2648 = vsyncadd (%p3129_p0), [#allocation9], 4294960256  ;;  %2166 = vmatprep.subr.bf16.mxu0 %v2411_v0  ;;  %v2414_v2 = vld [vmem:[%s2939_s27] sm:$0xff]   ;;  %v2418_v4 = vld [vmem:[#allocation8 + $0x14] sm:$0xff]   ;;  %v400_v5 = vsel %vm398_vm1, %v2413_v3, 0  ;;  %vm2676_vm2 = vmmov 0  }
  0x97   : > { %2167 = vmatpush3.bf16.msra.mxu0 %v2411_v0  ;;  %2172 = vmatprep.mubr.msk.bf16.mxu0 %vm385_vm0, %v2414_v2  ;;  %v2419_v6 = vld [vmem:[#allocation8 + $0x1c] sm:$0xff]   ;;  %v2415_v7 = vld [vmem:[%s2939_s27 + $0x8] sm:$0xff]   ;;  %v2416_v8 = vld [vmem:[%s2939_s27 + $0x10] sm:$0xff]   ;;  %vm1512_vm3 = vcmask 1041409   ;;  %vm1514_vm4 = vcmask 1042434   ;;  %vm1516_vm5 = vcmask 1043459  }
  0x98   : > { %2168 = vmatprep.subr.bf16.mxu0 %v2412_v1  ;;  %2180 = vmatprep.subr.bf16.mxu1 %v2418_v4  ;;  %v2420_v9 = vld [vmem:[#allocation8 + $0x24] sm:$0xff]   ;;  %v2421_v10 = vld [vmem:[#allocation8 + $0x2c] sm:$0xff]   ;;  %v2417_v11 = vld [vmem:[%s2939_s27 + $0x18] sm:$0xff]   ;;  %vm1518_vm6 = vcmask 1044484   ;;  %vm1520_vm7 = vcmask 1045509   ;;  %vm1522_vm8 = vcmask 1046534  }
  0x99   : > { %2181 = vmatpush3.bf16.msra.mxu1 %v2418_v4  ;;  %v2422_v12 = vld [vmem:[#allocation8 + $0x34] sm:$0xff]   ;;  %v2423_v13 = vld [vmem:[#allocation8 + $0x3c] sm:$0xff]   ;;  %v2424_v14 = vld [vmem:[#allocation8 + $0x44] sm:$0xff]   ;;  %vm1524_vm9 = vcmask 1047559   ;;  %vm1628_vm10 = vcmask 261120   ;;  %s1964_s26 = sshll.u32 %s2927_s13, 3 }
  0x9a   : > { %2182 = vmatprep.subr.bf16.mxu1 %v2419_v6  ;;  %v2425_v15 = vld [vmem:[#allocation8 + $0x4c] sm:$0xff]   ;;  %v2426_v16 = vld [vmem:[#allocation8 + $0x94] sm:$0xff]   ;;  %v2434_v18 = vld [vmem:[#allocation8 + $0x5c] sm:$0xff]   ;;  %s331_s29 = scalar_lea.vmem [#allocation10], %s1964_s26  ;;  %s1811_s8 = scalar_lea.sflag [#allocation4], %s2927_s13 }
  0x9b   : > { %2169 = vmatpush3.bf16.msra.mxu0 %v2412_v1  ;;  %v2433_v17 = vld [vmem:[#allocation8 + $0x54] sm:$0xff]   ;;  %v2435_v19 = vld [vmem:[#allocation8 + $0x64] sm:$0xff]   ;;  %v2436_v20 = vld [vmem:[#allocation8 + $0x6c] sm:$0xff]   ;;  %s1824_s11 = sshll.u32 %s331_s29, 4  ;;  %p3130_p9 = scmp.ne.s32.totalorder %s3117_s30, 0  ;;  %s3041_s11 = int_to_ptr.vmem [resolvable:$true] %s1824_s11 }
  0x9c   : > { %2338 = vmatprep.subr.msk.bf16.mxu0 %vm398_vm1, %v2413_v3  ;;  %v2437_v21 = vld [vmem:[#allocation8 + $0x74] sm:$0xff]   ;;  %v2438_v22 = vld [vmem:[#allocation8 + $0x7c] sm:$0xff]   ;;  %v2428_v50 = vld [vmem:[#allocation8 + $0xa4] ss:$0 sps:$4 sm:$0xff]   ;;  %s2593_s20 = scalar_lea.vmem %s3041_s11, 128 }
  0x9d   : > { %2183 = vmatpush3.bf16.msra.mxu1 %v2419_v6  ;;  %v1976_v23 = vld [vmem:[%s3087_s4] ss:$0 sm:$0xff]  ;;  %v2427_v41 = vld [vmem:[#allocation8 + $0x9c] sm:$0xff]   ;;  %v969_v55 = vsel %vm398_vm1, %v2428_v50, 0  ;;  %v2430_v56 = vld [vmem:[%s2945_s6 + $0x8] sm:$0xff]   ;;  %p2594_p3 = scmp.ne.s32.totalorder %s3041_s11, %s2593_s20 }
  0x9e   : > { %2184 = vmatprep.subr.bf16.mxu1 %v2420_v9  ;;  %v2429_v54 = vld [vmem:[%s2945_s6] sm:$0xff]   ;;  %v2431_v57 = vld [vmem:[%s2945_s6 + $0x10] sm:$0xff]   ;;  %v2432_v58 = vld [vmem:[%s2945_s6 + $0x18] sm:$0xff]  }
  0x9f   : > { %2171 = vmatpush3.bf16.msra.mxu0 %v400_v5  ;;  %v2439_v59 = vld [vmem:[#allocation8 + $0x84] sm:$0xff]   ;;  %v2440_v60 = vld [vmem:[#allocation8 + $0x8c] sm:$0xff]   ;;  %v1989_v62 = vld [vmem:[%s3087_s4 + $0x1] ss:$0 sm:$0xff]  ;;  %p2595_p12 = pnand %p2594_p3, %p3130_p9 }
  0xa0   : > { %2204 = vmatprep.subr.bf16.mxu0 %v2433_v17  ;;  %v2441_v61 = vld [vmem:[#allocation8 + $0xa8] sm:$0xff]  }
  0xa1   : > { %2185 = vmatpush3.bf16.msra.mxu1 %v2420_v9  ;;  %p2596_p4 = pneg %p2595_p12 }
  0xa2   : > { %2173 = vmatmul.mubr.msk.bf16.vlgmr.msra.gmra.mrb[0].mxu0 %vm385_vm0, %v2415_v7  ;;  %2186 = vmatprep.subr.bf16.mxu1 %v2421_v10 }
  0xa3   : > { %2176 = vmatprep.mubr.msk.bf16.mxu0 %vm385_vm0, %v2416_v8  ;;  %2205 = vmatpush3.bf16.msra.mxu0 %v2433_v17 }
  0xa4   : > { %2206 = vmatprep.subr.bf16.mxu0 %v2434_v18 }
  0xa5   : > { %2187 = vmatpush3.bf16.msra.mxu1 %v2421_v10 }
  0xa6   : > { %2188 = vmatprep.subr.bf16.mxu1 %v2422_v12 }
  0xa7   : > { %2207 = vmatpush3.bf16.msra.mxu0 %v2434_v18 }
  0xa8   : > { %2208 = vmatprep.subr.bf16.mxu0 %v2435_v19 }
  0xa9   : > { %2189 = vmatpush3.bf16.msra.mxu1 %v2422_v12 }
  0xaa   : > { %2177 = vmatmul.mubr.msk.bf16.gmra.mrb[4].mxu0 %vm385_vm0, %v2417_v11  ;;  %2190 = vmatprep.subr.bf16.mxu1 %v2423_v13 }
  0xab   : > { %2209 = vmatpush3.bf16.msra.mxu0 %v2435_v19 }
  0xac   : > { %2210 = vmatprep.subr.bf16.mxu0 %v2436_v20 }
  0xad   : > { %2191 = vmatpush3.bf16.msra.mxu1 %v2423_v13 }
  0xae   : > { %2192 = vmatprep.subr.bf16.mxu1 %v2424_v14 }
  0xaf   : > { %2211 = vmatpush3.bf16.msra.mxu0 %v2436_v20 }
  0xb0   : > { %2212 = vmatprep.subr.bf16.mxu0 %v2437_v21 }
  0xb1   : > { %2193 = vmatpush3.bf16.msra.mxu1 %v2424_v14 }
  0xb2   : > { %2194 = vmatprep.subr.bf16.mxu1 %v2425_v15 }
  0xb3   : > { %2213 = vmatpush3.bf16.msra.mxu0 %v2437_v21 }
  0xb4   : > { %2214 = vmatprep.subr.bf16.mxu0 %v2438_v22 }
  0xb5   : > { %2195 = vmatpush3.bf16.msra.mxu1 %v2425_v15 }
  0xb6   : > { %2228 = vmatprep.subr.bf16.mxu1 %v2426_v16 }
  0xb7   : > { %2215 = vmatpush3.bf16.msra.mxu0 %v2438_v22 }
  0xb8   : > { %2216 = vmatprep.subr.bf16.mxu0 %v2439_v59 }
  0xbb   : > { %2217 = vmatpush3.bf16.msra.mxu0 %v2439_v59 }
  0xbc   : > { %2218 = vmatprep.subr.bf16.mxu0 %v2440_v60 }
  0xbf   : > { %2219 = vmatpush3.bf16.msra.mxu0 %v2440_v60 }
  0xc0   : > { %2242 = vmatprep.subr.bf16.mxu0 %v2441_v61 }
 0x175   : > { %v2174_v24 = vpop.f32.mrb[0].mxu0 }
 0x176   : > { %v473_v25 = vadd.f32 %v2174_v24, %v1976_v23  ;;  %v436_v26 = vpop.f32.mrb[1].mxu0 }
 0x177   : > { %v471_v27 = vadd.f32 %v1976_v23, %v436_v26  ;;  %v2175_v28 = vpop.f32.mrb[2].mxu0 }
 0x178   : > { %v474_v29 = vadd.f32 %v2175_v28, %v1976_v23  ;;  %v439_v30 = vpop.f32.mrb[3].mxu0  ;;  %v481_v32 = vmax.f32 %v473_v25, 0.0  ;;  %v2443_v25 = vld [vmem:[#allocation8 + $0xb8] sm:$0xff]  }
 0x179   : > { %v472_v31 = vadd.f32 %v1976_v23, %v439_v30  ;;  %v479_v34 = vmax.f32 %v471_v27, 0.0  ;;  %v2014_v27 = vld [vmem:[%s3087_s4 + $0x3] ss:$0 sm:$0xff] }
 0x17a   : > { %v482_v33 = vmax.f32 %v474_v29, 0.0 }
 0x17b   : > { %v480_v35 = vmax.f32 %v472_v31, 0.0  ;;  %v2444_v31 = vld [vmem:[#allocation8 + $0xc0] sm:$0xff]  }
 0x17c   : > { %v2068_v36 = vpack.c.bf16 %v482_v33, %v481_v32 }
 0x17d   : > { %v2178_v37 = vpop.f32.mrb[4].mxu0  ;;  %v2067_v38 = vpack.c.bf16 %v480_v35, %v479_v34 }
 0x17e   : > { %v477_v39 = vadd.f32 %v2178_v37, %v1976_v23  ;;  %v452_v40 = vpop.f32.mrb[5].mxu0 }
 0x17f   : > { %v475_v42 = vadd.f32 %v1976_v23, %v452_v40  ;;  %v2179_v43 = vpop.f32.mrb[6].mxu0  ;;  %2196 = vmatprep.mubr.bf16.mxu1 %v2067_v38 }
 0x180   : > { %v485_v44 = vmax.f32 %v477_v39, 0.0  ;;  %v478_v45 = vadd.f32 %v2179_v43, %v1976_v23  ;;  %v455_v46 = vpop.f32.mrb[7].mxu0  ;;  %2197 = vmatmul.mubr.bf16.vlgmr.msra.gmra.mrb[0].mxu1 %v2068_v36 }
 0x181   : > { %v483_v47 = vmax.f32 %v475_v42, 0.0  ;;  %v476_v48 = vadd.f32 %v1976_v23, %v455_v46  ;;  %2229 = vmatpush3.bf16.msra.mxu1 %v2426_v16  ;;  %v2442_v16 = vld [vmem:[#allocation8 + $0xb0] sm:$0xff]  }
 0x182   : > { %v486_v49 = vmax.f32 %v478_v45, 0.0  ;;  %2230 = vmatprep.subr.bf16.mxu1 %v2427_v41 }
 0x183   : > { %v484_v51 = vmax.f32 %v476_v48, 0.0 }
 0x184   : > { %v2070_v52 = vpack.c.bf16 %v486_v49, %v485_v44 }
 0x185   : > { %v2069_v53 = vpack.c.bf16 %v484_v51, %v483_v47  ;;  %2231 = vmatpush3.bf16.msra.mxu1 %v2427_v41  ;;  %v2445_v41 = vld [vmem:[#allocation8 + $0xc8] sm:$0xff]   ;;  %v2446_v47 = vld [vmem:[#allocation8 + $0xd0] sm:$0xff]  }
 0x186   : > { %2339 = vmatprep.subr.msk.bf16.mxu1 %vm398_vm1, %v2428_v50 }
 0x187   : > { %2200 = vmatprep.mubr.bf16.mxu1 %v2069_v53 }
 0x188   : > { %2201 = vmatmul.mubr.bf16.gmra.mrb[4].mxu1 %v2070_v52 }
 0x189   : > { %2233 = vmatpush3.bf16.msra.mxu1 %v969_v55  ;;  %2234 = vmatprep.mubr.msk.bf16.mxu1 %vm385_vm0, %v2429_v54 }
 0x190   : > { %2235 = vmatmul.mubr.msk.bf16.vlgmr.msra.gmra.mrb[8].mxu1 %vm385_vm0, %v2430_v56 }
 0x191   : > { %2238 = vmatprep.mubr.msk.bf16.mxu1 %vm385_vm0, %v2431_v57  ;;  %v2447_v57 = vld [vmem:[#allocation8 + $0xd8] sm:$0xff]  }
 0x198   : > { %2239 = vmatmul.mubr.msk.bf16.gmra.mrb[12].mxu1 %vm385_vm0, %v2432_v58 }
 0x253   : > { %v2198_v63 = vpop.f32.mrb[0].mxu1 }
 0x254   : > { %v655_v0 = vadd.f32 %v2198_v63, %v1989_v62  ;;  %v618_v1 = vpop.f32.mrb[1].mxu1  ;;  %v2449_v63 = vld [vmem:[#allocation8 + $0x128] sm:$0xff]  }
 0x255   : > { %v653_v2 = vadd.f32 %v1989_v62, %v618_v1  ;;  %v2199_v3 = vpop.f32.mrb[2].mxu1  ;;  %v2450_v1 = vld [vmem:[#allocation8 + $0xe8] sm:$0xff]  }
 0x256   : > { %v656_v4 = vadd.f32 %v2199_v3, %v1989_v62  ;;  %v621_v5 = vpop.f32.mrb[3].mxu1  ;;  %v663_v7 = vmax.f32 %v655_v0, 0.0  ;;  %v2675_v0 = vmov 0.0   ;;  %2266 = vmatprep.subr.bf16.mxu1 %v2450_v1  ;;  %v2452_v3 = vld [vmem:[#allocation8 + $0xf0] sm:$0xff]  }
 0x257   : > { %v654_v6 = vadd.f32 %v1989_v62, %v621_v5  ;;  %v661_v9 = vmax.f32 %v653_v2, 0.0  ;;  %v2451_v2 = vld [vmem:[#allocation8 + $0x130] sm:$0xff]   ;;  %2267 = vmatpush3.bf16.msra.mxu1 %v2450_v1  ;;  %v2454_v5 = vld [vmem:[#allocation8 + $0xf8] sm:$0xff]  }
 0x258   : > { %v664_v8 = vmax.f32 %v656_v4, 0.0  ;;  %v2453_v4 = vld [vmem:[#allocation8 + $0x138] sm:$0xff]   ;;  %2268 = vmatprep.subr.bf16.mxu1 %v2452_v3 }
 0x259   : > { %v662_v10 = vmax.f32 %v654_v6, 0.0  ;;  %v2455_v6 = vld [vmem:[#allocation8 + $0x140] sm:$0xff]  }
 0x25a   : > { %v2072_v11 = vpack.c.bf16 %v664_v8, %v663_v7  ;;  %v2456_v7 = vld [vmem:[#allocation8 + $0x100] sm:$0xff]   ;;  %v2457_v8 = vld [vmem:[#allocation8 + $0x148] sm:$0xff]  }
 0x25b   : > { %v2071_v12 = vpack.c.bf16 %v662_v10, %v661_v9  ;;  %v2202_v13 = vpop.f32.mrb[4].mxu1  ;;  %2269 = vmatpush3.bf16.msra.mxu1 %v2452_v3  ;;  %v2458_v9 = vld [vmem:[#allocation8 + $0x108] sm:$0xff]   ;;  %v2459_v10 = vld [vmem:[#allocation8 + $0x150] sm:$0xff]  }
 0x25c   : > { %v659_v14 = vadd.f32 %v2202_v13, %v1989_v62  ;;  %v634_v15 = vpop.f32.mrb[5].mxu1  ;;  %2270 = vmatprep.subr.bf16.mxu1 %v2454_v5  ;;  %v2462_v13 = vld [vmem:[#allocation8 + $0x118] sm:$0xff]  }
 0x25d   : > { %v657_v17 = vadd.f32 %v1989_v62, %v634_v15  ;;  %v2203_v18 = vpop.f32.mrb[6].mxu1  ;;  %2220 = vmatprep.mubr.bf16.mxu0 %v2071_v12  ;;  %v2461_v12 = vld [vmem:[#allocation8 + $0x158] sm:$0xff]   ;;  %v2464_v15 = vld [vmem:[#allocation8 + $0x120] sm:$0xff]  }
 0x25e   : > { %v667_v19 = vmax.f32 %v659_v14, 0.0  ;;  %v660_v20 = vadd.f32 %v2203_v18, %v1989_v62  ;;  %v637_v21 = vpop.f32.mrb[7].mxu1  ;;  %2221 = vmatmul.mubr.bf16.vlgmr.msra.gmra.mrb[8].mxu0 %v2072_v11  ;;  %v2460_v11 = vld [vmem:[#allocation8 + $0x110] sm:$0xff]   ;;  %v2463_v14 = vld [vmem:[#allocation8 + $0x160] sm:$0xff]  }
 0x25f   : > { %v665_v22 = vmax.f32 %v657_v17, 0.0  ;;  %v658_v23 = vadd.f32 %v1989_v62, %v637_v21  ;;  %2243 = vmatpush3.bf16.msra.mxu0 %v2441_v61  ;;  %v2448_v62 = vld [vmem:[#allocation8 + $0xe0] sm:$0xff]   ;;  %2271 = vmatpush3.bf16.msra.mxu1 %v2454_v5 }
 0x260   : > { %v668_v24 = vmax.f32 %v660_v20, 0.0  ;;  %2244 = vmatprep.subr.bf16.mxu0 %v2442_v16  ;;  %2272 = vmatprep.subr.bf16.mxu1 %v2456_v7 }
 0x261   : > { %v666_v26 = vmax.f32 %v658_v23, 0.0 }
 0x262   : > { %v2074_v28 = vpack.c.bf16 %v668_v24, %v667_v19 }
 0x263   : > { %v2073_v29 = vpack.c.bf16 %v666_v26, %v665_v22  ;;  %2245 = vmatpush3.bf16.msra.mxu0 %v2442_v16  ;;  %v2236_v30 = vpop.f32.mrb[8].mxu1  ;;  %2273 = vmatpush3.bf16.msra.mxu1 %v2456_v7  ;;  %v2002_v16 = vld [vmem:[%s3087_s4 + $0x2] ss:$0 sm:$0xff] }
 0x264   : > { %2246 = vmatprep.subr.bf16.mxu0 %v2443_v25  ;;  %v1042_v32 = vadd.f32 %v2236_v30, %v2014_v27  ;;  %v1005_v33 = vpop.f32.mrb[9].mxu1  ;;  %2274 = vmatprep.subr.bf16.mxu1 %v2458_v9 }
 0x265   : > { %2224 = vmatprep.mubr.bf16.mxu0 %v2073_v29  ;;  %v1040_v34 = vadd.f32 %v2014_v27, %v1005_v33  ;;  %v2237_v35 = vpop.f32.mrb[10].mxu1 }
 0x266   : > { %2225 = vmatmul.mubr.bf16.gmra.mrb[12].mxu0 %v2074_v28  ;;  %v1050_v36 = vmax.f32 %v1042_v32, 0.0  ;;  %v1043_v37 = vadd.f32 %v2237_v35, %v2014_v27  ;;  %v1008_v38 = vpop.f32.mrb[11].mxu1 }
 0x267   : > { %2247 = vmatpush3.bf16.msra.mxu0 %v2443_v25  ;;  %v1048_v39 = vmax.f32 %v1040_v34, 0.0  ;;  %v1041_v40 = vadd.f32 %v2014_v27, %v1008_v38  ;;  %2275 = vmatpush3.bf16.msra.mxu1 %v2458_v9 }
 0x268   : > { %2248 = vmatprep.subr.bf16.mxu0 %v2444_v31  ;;  %v1051_v42 = vmax.f32 %v1043_v37, 0.0  ;;  %2276 = vmatprep.subr.bf16.mxu1 %v2460_v11 }
 0x269   : > { %v1049_v43 = vmax.f32 %v1041_v40, 0.0 }
 0x26a   : > { %v2076_v44 = vpack.c.bf16 %v1051_v42, %v1050_v36 }
 0x26b   : > { %2249 = vmatpush3.bf16.msra.mxu0 %v2444_v31  ;;  %v2075_v45 = vpack.c.bf16 %v1049_v43, %v1048_v39  ;;  %v2240_v46 = vpop.f32.mrb[12].mxu1  ;;  %2277 = vmatpush3.bf16.msra.mxu1 %v2460_v11 }
 0x26c   : > { %2250 = vmatprep.subr.bf16.mxu0 %v2445_v41  ;;  %v1046_v48 = vadd.f32 %v2240_v46, %v2014_v27  ;;  %v1021_v49 = vpop.f32.mrb[13].mxu1  ;;  %2278 = vmatprep.subr.bf16.mxu1 %v2462_v13 }
 0x26d   : > { %v1044_v50 = vadd.f32 %v2014_v27, %v1021_v49  ;;  %v2241_v51 = vpop.f32.mrb[14].mxu1  ;;  %2258 = vmatprep.mubr.bf16.mxu0 %v2075_v45 }
 0x26e   : > { %v1054_v52 = vmax.f32 %v1046_v48, 0.0  ;;  %v1047_v53 = vadd.f32 %v2241_v51, %v2014_v27  ;;  %v1024_v54 = vpop.f32.mrb[15].mxu1 }
 0x26f   : > { %2251 = vmatpush3.bf16.msra.mxu0 %v2445_v41  ;;  %v1052_v55 = vmax.f32 %v1044_v50, 0.0  ;;  %v1045_v56 = vadd.f32 %v2014_v27, %v1024_v54  ;;  %2279 = vmatpush3.bf16.msra.mxu1 %v2462_v13 }
 0x270   : > { %2252 = vmatprep.subr.bf16.mxu0 %v2446_v47  ;;  %v1055_v58 = vmax.f32 %v1047_v53, 0.0  ;;  %2280 = vmatprep.subr.bf16.mxu1 %v2464_v15 }
 0x271   : > { %v1053_v59 = vmax.f32 %v1045_v56, 0.0 }
 0x272   : > { %v2078_v60 = vpack.c.bf16 %v1055_v58, %v1054_v52 }
 0x273   : > { %2253 = vmatpush3.bf16.msra.mxu0 %v2446_v47  ;;  %v2077_v61 = vpack.c.bf16 %v1053_v59, %v1052_v55  ;;  %2281 = vmatpush3.bf16.msra.mxu1 %v2464_v15 }
 0x274   : > { %2254 = vmatprep.subr.bf16.mxu0 %v2447_v57  ;;  %2318 = vmatprep.subr.bf16.mxu1 %v2675_v0 }
 0x277   : > { %2255 = vmatpush3.bf16.msra.mxu0 %v2447_v57 }
 0x278   : > { %2256 = vmatprep.subr.bf16.mxu0 %v2448_v62 }
 0x27b   : > { %2257 = vmatpush3.bf16.msra.mxu0 %v2448_v62 }
 0x27c   : > { %2290 = vmatprep.subr.bf16.mxu0 %v2675_v0 }
 0x27e   : > { %2259 = vmatmul.mubr.bf16.vlgmr.msra.gmra.mrb[16].mxu0 %v2076_v44 }
 0x27f   : > { %2262 = vmatprep.mubr.bf16.mxu0 %v2077_v61  ;;  %2291 = vmatpush3.bf16.msra.mxu0 %v2449_v63 }
 0x280   : > { %2292 = vmatprep.subr.bf16.mxu0 %v2675_v0 }
 0x283   : > { %2293 = vmatpush3.bf16.msra.mxu0 %v2451_v2 }
 0x284   : > { %2294 = vmatprep.subr.bf16.mxu0 %v2675_v0 }
 0x286   : > { %2263 = vmatmul.mubr.bf16.gmra.mrb[20].mxu0 %v2078_v60 }
 0x287   : > { %2295 = vmatpush3.bf16.msra.mxu0 %v2453_v4  ;;  %2306 = vmatprep.mubr.msk.bf16.mxu0 %vm2676_vm2, %v2675_v0 }
 0x288   : > { %2296 = vmatprep.subr.bf16.mxu0 %v2675_v0 }
 0x28b   : > { %2297 = vmatpush3.bf16.msra.mxu0 %v2455_v6 }
 0x28c   : > { %2298 = vmatprep.subr.bf16.mxu0 %v2675_v0 }
 0x28f   : > { %2299 = vmatpush3.bf16.msra.mxu0 %v2457_v8 }
 0x290   : > { %2300 = vmatprep.subr.bf16.mxu0 %v2675_v0 }
 0x293   : > { %2301 = vmatpush3.bf16.msra.mxu0 %v2459_v10 }
 0x294   : > { %2302 = vmatprep.subr.bf16.mxu0 %v2675_v0 }
 0x297   : > { %2303 = vmatpush3.bf16.msra.mxu0 %v2461_v12 }
 0x298   : > { %2304 = vmatprep.subr.bf16.mxu0 %v2675_v0 }
 0x29b   : > { %2305 = vmatpush3.bf16.msra.mxu0 %v2463_v14 }
 0x29c   : > { %2310 = vmatprep.subr.bf16.mxu0 %v2675_v0 }
 0x331   : > { %v2222_v17 = vpop.f32.mrb[8].mxu0 }
 0x332   : > { %v837_v18 = vadd.f32 %v2222_v17, %v2002_v16  ;;  %v800_v19 = vpop.f32.mrb[9].mxu0 }
 0x333   : > { %v835_v20 = vadd.f32 %v2002_v16, %v800_v19  ;;  %v2223_v21 = vpop.f32.mrb[10].mxu0 }
 0x334   : > { %v845_v22 = vmax.f32 %v837_v18, 0.0  ;;  %v838_v23 = vadd.f32 %v2223_v21, %v2002_v16  ;;  %v803_v24 = vpop.f32.mrb[11].mxu0 }
 0x335   : > { %v843_v25 = vmax.f32 %v835_v20, 0.0  ;;  %v836_v26 = vadd.f32 %v2002_v16, %v803_v24 }
 0x336   : > { %v863_v27 = vrot.slane %v845_v22, 4  ;;  %v846_v28 = vmax.f32 %v838_v23, 0.0 }
 0x337   : > { %v851_v29 = vrot.slane %v843_v25, 4  ;;  %v844_v30 = vmax.f32 %v836_v26, 0.0 }
 0x338   : > { %v864_v31 = vmax.f32 %v845_v22, %v863_v27  ;;  %v869_v32 = vrot.slane %v846_v28, 4 }
 0x339   : > { %v852_v33 = vmax.f32 %v843_v25, %v851_v29  ;;  %v857_v34 = vrot.slane %v844_v30, 4  ;;  %v2226_v35 = vpop.f32.mrb[12].mxu0 }
 0x33a   : > { %v865_v36 = vrot.slane %v864_v31, 2  ;;  %v870_v37 = vmax.f32 %v846_v28, %v869_v32  ;;  %v841_v38 = vadd.f32 %v2226_v35, %v2002_v16  ;;  %v816_v39 = vpop.f32.mrb[13].mxu0 }
 0x33b   : > { %v853_v40 = vrot.slane %v852_v33, 2  ;;  %v858_v41 = vmax.f32 %v844_v30, %v857_v34  ;;  %v839_v42 = vadd.f32 %v2002_v16, %v816_v39  ;;  %v2227_v43 = vpop.f32.mrb[14].mxu0 }
 0x33c   : > { %v866_v44 = vmax.f32 %v864_v31, %v865_v36  ;;  %v871_v45 = vrot.slane %v870_v37, 2  ;;  %v849_v46 = vmax.f32 %v841_v38, 0.0  ;;  %v842_v47 = vadd.f32 %v2227_v43, %v2002_v16  ;;  %v819_v48 = vpop.f32.mrb[15].mxu0 }
 0x33d   : > { %v854_v49 = vmax.f32 %v852_v33, %v853_v40  ;;  %v859_v50 = vrot.slane %v858_v41, 2  ;;  %v847_v51 = vmax.f32 %v839_v42, 0.0  ;;  %v840_v52 = vadd.f32 %v2002_v16, %v819_v48 }
 0x33e   : > { %v867_v53 = vrot.slane %v866_v44, 1  ;;  %v872_v54 = vmax.f32 %v870_v37, %v871_v45  ;;  %v887_v55 = vrot.slane %v849_v46, 4  ;;  %v850_v56 = vmax.f32 %v842_v47, 0.0 }
 0x33f   : > { %v855_v57 = vrot.slane %v854_v49, 1  ;;  %v860_v58 = vmax.f32 %v858_v41, %v859_v50  ;;  %v875_v59 = vrot.slane %v847_v51, 4  ;;  %v848_v60 = vmax.f32 %v840_v52, 0.0 }
 0x340   : > { %v868_v61 = vmax.f32 %v866_v44, %v867_v53  ;;  %v873_v62 = vrot.slane %v872_v54, 1  ;;  %v888_v63 = vmax.f32 %v849_v46, %v887_v55  ;;  %v893_v1 = vrot.slane %v850_v56, 4  ;;  %v2027_v44 = vld [vmem:[%s3087_s4 + $0x4] ss:$0 sm:$0xff]  ;;  %v2465_v55 = vld [vmem:[#allocation8 + $0x1a8] sm:$0xff]  }
 0x341   : > { %v856_v2 = vmax.f32 %v854_v49, %v855_v57  ;;  %v861_v3 = vrot.slane %v860_v58, 1  ;;  %v876_v4 = vmax.f32 %v847_v51, %v875_v59  ;;  %v881_v5 = vrot.slane %v848_v60, 4 }
 0x342   : > { %v874_v6 = vmax.f32 %v872_v54, %v873_v62  ;;  %v889_v7 = vrot.slane %v888_v63, 2  ;;  %v894_v8 = vmax.f32 %v850_v56, %v893_v1  ;;  %v901_v13 = vpack.c.bf16 %v868_v61, %v868_v61  ;;  %v2466_v1 = vld [vmem:[#allocation8 + $0x1b0] sm:$0xff]  }
 0x343   : > { %v899_v9 = vpack.c.bf16 %v856_v2, %v856_v2  ;;  %v862_v10 = vmax.f32 %v860_v58, %v861_v3  ;;  %v877_v11 = vrot.slane %v876_v4, 2  ;;  %v882_v12 = vmax.f32 %v848_v60, %v881_v5 }
 0x344   : > { %v890_v14 = vmax.f32 %v888_v63, %v889_v7  ;;  %v895_v15 = vrot.slane %v894_v8, 2  ;;  %v902_v16 = vpack.c.bf16 %v874_v6, %v874_v6  ;;  %v1506_v26 = vunpack.c.l.b16 %v901_v13 }
 0x345   : > { %v900_v17 = vpack.c.bf16 %v862_v10, %v862_v10  ;;  %v878_v18 = vmax.f32 %v876_v4, %v877_v11  ;;  %v883_v19 = vrot.slane %v882_v12, 2  ;;  %v1504_v22 = vunpack.c.l.b16 %v899_v9  ;;  %v335_v9 = vld [vmem:[%s2931_s21] sm:$0xf]  ;;  %s2062_s21 = sshll.u32 %s2807_s17, 7  ;;  %s2677_s17 = smov [#allocation10]  }
 0x346   : > { %v891_v20 = vrot.slane %v890_v14, 1  ;;  %v896_v21 = vmax.f32 %v894_v8, %v895_v15  ;;  %v1507_v29 = vunpack.c.l.b16 %v902_v16  ;;  %s3039_s6 = scalar_lea.hbm %s3088_s5, %s2062_s21  ;;  %s2597_s22 = sshll.u32 %s2677_s17, 4  ;;  %s2598_s22 = int_to_ptr.vmem [resolvable:$false] %s2597_s22 }
 0x347   : > { %v1505_v23 = vunpack.c.l.b16 %v900_v17  ;;  %v879_v24 = vrot.slane %v878_v18, 1  ;;  %v884_v25 = vmax.f32 %v882_v12, %v883_v19  ;;  %v2467_v19 = vld [vmem:[#allocation8 + $0x168] sm:$0xff]   ;;  %s2599_s10 = scalar_lea.vmem %s2598_s22, 256  ;;  %p2600_p8 = scmp.lt.s32.totalorder %s3041_s11, %s2598_s22 }
 0x348   : > { %v892_v27 = vmax.f32 %v890_v14, %v891_v20  ;;  %v897_v28 = vrot.slane %v896_v21, 1  ;;  %v2468_v20 = vld [vmem:[#allocation8 + $0x170] sm:$0xff]   ;;  %p2601_p5 = scmp.lt.s32.totalorder %s2599_s10, %s2593_s20 }
 0x349   : > { %v1513_v30 = vsel %vm1512_vm3, %v1505_v23, %v1504_v22  ;;  %v880_v31 = vmax.f32 %v878_v18, %v879_v24  ;;  %v885_v32 = vrot.slane %v884_v25, 1  ;;  %v2470_v22 = vld [vmem:[#allocation8 + $0x180] sm:$0xff]   ;;  %v2471_v23 = vld [vmem:[#allocation8 + $0x188] sm:$0xff]   ;;  %v2472_v24 = vld [vmem:[#allocation8 + $0x190] sm:$0xff]  }
 0x34a   : > { %v1515_v33 = vsel %vm1514_vm4, %v1506_v26, %v1513_v30  ;;  %v898_v34 = vmax.f32 %v896_v21, %v897_v28  ;;  %v905_v38 = vpack.c.bf16 %v892_v27, %v892_v27  ;;  %v2469_v21 = vld [vmem:[#allocation8 + $0x178] sm:$0xff]   ;;  %v2474_v26 = vld [vmem:[#allocation8 + $0x1a0] sm:$0xff]   ;;  %p2602_p7 = por %p2601_p5, %p2600_p8 }
 0x34b   : > { %v903_v35 = vpack.c.bf16 %v880_v31, %v880_v31  ;;  %v1517_v36 = vsel %vm1516_vm5, %v1507_v29, %v1515_v33  ;;  %v886_v37 = vmax.f32 %v884_v25, %v885_v32  ;;  %v2473_v25 = vld [vmem:[#allocation8 + $0x198] sm:$0xff]  }
 0x34c   : > { %v906_v40 = vpack.c.bf16 %v898_v34, %v898_v34  ;;  %v1510_v45 = vunpack.c.l.b16 %v905_v38  ;;  %v2040_v31 = vld [vmem:[%s3087_s4 + $0x5] ss:$0 sm:$0xff]  ;;  %p2603_p11 = pnand %p2602_p7, %p2596_p4 }
 0x34d   : > { %v1508_v39 = vunpack.c.l.b16 %v903_v35  ;;  %v904_v41 = vpack.c.bf16 %v886_v37, %v886_v37 }
 0x34e   : > { %v1511_v46 = vunpack.c.l.b16 %v906_v40 }
 0x34f   : > { %v1519_v42 = vsel %vm1518_vm6, %v1508_v39, %v1517_v36  ;;  %v1509_v43 = vunpack.c.l.b16 %v904_v41 }
 0x351   : > { %v1521_v47 = vsel %vm1520_vm7, %v1509_v43, %v1519_v42  ;;  %v2260_v48 = vpop.f32.mrb[16].mxu0 }
 0x352   : > { %v1224_v49 = vadd.f32 %v2260_v48, %v2027_v44  ;;  %v1187_v50 = vpop.f32.mrb[17].mxu0  ;;  %v1523_v51 = vsel %vm1522_vm8, %v1510_v45, %v1521_v47 }
 0x353   : > { %v1222_v52 = vadd.f32 %v2027_v44, %v1187_v50  ;;  %v2261_v53 = vpop.f32.mrb[18].mxu0  ;;  %v1525_v54 = vsel %vm1524_vm9, %v1511_v46, %v1523_v51 }
 0x354   : > { %v1225_v56 = vadd.f32 %v2261_v53, %v2027_v44  ;;  %v1190_v57 = vpop.f32.mrb[19].mxu0  ;;  %v1526_v58 = vpack.c.b16 %v1525_v54, %v1525_v54  ;;  %v1232_v60 = vmax.f32 %v1224_v49, 0.0 }
 0x355   : > { %v1223_v59 = vadd.f32 %v2027_v44, %v1190_v57  ;;  %v1230_v62 = vmax.f32 %v1222_v52, 0.0 }
 0x356   : > { %v1233_v61 = vmax.f32 %v1225_v56, 0.0  ;;  %2307 = vmatmul.mubr.bf16.vlgmr.msra.gmra.mrb[24].mxu0 %v1526_v58 }
 0x357   : > { %v1231_v63 = vmax.f32 %v1223_v59, 0.0  ;;  %2311 = vmatpush3.bf16.msra.mxu0 %v2465_v55  ;;  %2314 = vmatprep.mubr.msk.bf16.mxu0 %vm2676_vm2, %v2675_v0 }
 0x358   : > { %v2080_v2 = vpack.c.bf16 %v1233_v61, %v1232_v60  ;;  %2312 = vmatprep.subr.bf16.mxu0 %v2675_v0 }
 0x359   : > { %v2079_v3 = vpack.c.bf16 %v1231_v63, %v1230_v62  ;;  %v2264_v4 = vpop.f32.mrb[20].mxu0 }
 0x35a   : > { %v1228_v5 = vadd.f32 %v2264_v4, %v2027_v44  ;;  %v1203_v6 = vpop.f32.mrb[21].mxu0 }
 0x35b   : > { %v1226_v7 = vadd.f32 %v2027_v44, %v1203_v6  ;;  %v2265_v8 = vpop.f32.mrb[22].mxu0  ;;  %2282 = vmatprep.mubr.bf16.mxu1 %v2079_v3  ;;  %2313 = vmatpush3.bf16.msra.mxu0 %v2466_v1 }
 0x35c   : > { %v1229_v10 = vadd.f32 %v2265_v8, %v2027_v44  ;;  %v1206_v11 = vpop.f32.mrb[23].mxu0  ;;  %2283 = vmatmul.mubr.bf16.vlgmr.msra.gmra.mrb[16].mxu1 %v2080_v2  ;;  %v1236_v13 = vmax.f32 %v1228_v5, 0.0 }
 0x35d   : > { %v1227_v12 = vadd.f32 %v2027_v44, %v1206_v11  ;;  %v1234_v15 = vmax.f32 %v1226_v7, 0.0  ;;  %2319 = vmatpush3.bf16.msra.mxu1 %v2467_v19 }
 0x35e   : > { %v1237_v14 = vmax.f32 %v1229_v10, 0.0  ;;  %2315 = vmatmul.mubr.msk.bf16.vlgmr.msra.gmra.mrb[28].mxu0 %vm1628_vm10, %v335_v9  ;;  %2320 = vmatprep.subr.bf16.mxu1 %v2675_v0 }
 0x35f   : > { %v1235_v16 = vmax.f32 %v1227_v12, 0.0 }
 0x360   : > { %v2082_v17 = vpack.c.bf16 %v1237_v14, %v1236_v13 }
 0x361   : > { %v2081_v18 = vpack.c.bf16 %v1235_v16, %v1234_v15  ;;  %2321 = vmatpush3.bf16.msra.mxu1 %v2468_v20 }
 0x362   : > { %2322 = vmatprep.subr.bf16.mxu1 %v2675_v0 }
 0x363   : > { %2286 = vmatprep.mubr.bf16.mxu1 %v2081_v18 }
 0x364   : > { %2287 = vmatmul.mubr.bf16.gmra.mrb[20].mxu1 %v2082_v17 }
 0x365   : > { %2334 = vmatprep.mubr.msk.bf16.mxu1 %vm2676_vm2, %v2675_v0  ;;  %2323 = vmatpush3.bf16.msra.mxu1 %v2469_v21 }
 0x366   : > { %2324 = vmatprep.subr.bf16.mxu1 %v2675_v0 }
 0x369   : > { %2325 = vmatpush3.bf16.msra.mxu1 %v2470_v22 }
 0x36a   : > { %2326 = vmatprep.subr.bf16.mxu1 %v2675_v0 }
 0x36d   : > { %2327 = vmatpush3.bf16.msra.mxu1 %v2471_v23 }
 0x36e   : > { %2328 = vmatprep.subr.bf16.mxu1 %v2675_v0 }
 0x371   : > { %2329 = vmatpush3.bf16.msra.mxu1 %v2472_v24 }
 0x372   : > { %2330 = vmatprep.subr.bf16.mxu1 %v2675_v0 }
 0x375   : > { %2331 = vmatpush3.bf16.msra.mxu1 %v2473_v25 }
 0x376   : > { %2332 = vmatprep.subr.bf16.mxu1 %v2675_v0 }
 0x379   : > { %2333 = vmatpush3.bf16.msra.mxu1 %v2474_v26 }
 0x429   : > { %v1610_v27 = vpop.f32.mrb[24].mxu0 }
 0x42a   : > { %v2308_v28 = vpop.f32.mrb[25].mxu0 }
 0x42b   : > { %v1613_v29 = vpop.f32.mrb[26].mxu0 }
 0x42c   : > { %v2309_v30 = vpop.f32.mrb[27].mxu0 }
 0x42f   : > { %v2284_v32 = vpop.f32.mrb[16].mxu1 }
 0x430   : > { %v1406_v33 = vadd.f32 %v2284_v32, %v2040_v31  ;;  %v1369_v34 = vpop.f32.mrb[17].mxu1 }
 0x431   : > { %v1404_v35 = vadd.f32 %v2040_v31, %v1369_v34  ;;  %v2285_v36 = vpop.f32.mrb[18].mxu1  ;;  %v1666_v37 = vpop.f32.mrb[28].mxu0 }
 0x432   : > { %v1414_v38 = vmax.f32 %v1406_v33, 0.0  ;;  %v1407_v39 = vadd.f32 %v2285_v36, %v2040_v31  ;;  %v1372_v40 = vpop.f32.mrb[19].mxu1  ;;  %v3021_v0 = vadd.f32 %v1666_v37, %v1610_v27  ;;  %v2316_v41 = vpop.f32.mrb[29].mxu0 }
 0x433   : > { %v1412_v42 = vmax.f32 %v1404_v35, 0.0  ;;  %v1405_v43 = vadd.f32 %v2040_v31, %v1372_v40  ;;  %v1669_v44 = vpop.f32.mrb[30].mxu0 }
 0x434   : > { %v1432_v45 = vrot.slane %v1414_v38, 4  ;;  %v1415_v46 = vmax.f32 %v1407_v39, 0.0  ;;  %v2317_v47 = vpop.f32.mrb[31].mxu0 }
 0x435   : > { %v1420_v48 = vrot.slane %v1412_v42, 4  ;;  %v1413_v49 = vmax.f32 %v1405_v43, 0.0 }
 0x436   : > { %v1433_v50 = vmax.f32 %v1414_v38, %v1432_v45  ;;  %v1438_v51 = vrot.slane %v1415_v46, 4 }
 0x437   : > { %v1421_v52 = vmax.f32 %v1412_v42, %v1420_v48  ;;  %v1426_v53 = vrot.slane %v1413_v49, 4  ;;  %v2288_v54 = vpop.f32.mrb[20].mxu1 }
 0x438   : > { %v1434_v55 = vrot.slane %v1433_v50, 2  ;;  %v1439_v56 = vmax.f32 %v1415_v46, %v1438_v51  ;;  %v1410_v57 = vadd.f32 %v2288_v54, %v2040_v31  ;;  %v1385_v58 = vpop.f32.mrb[21].mxu1 }
 0x439   : > { %v1422_v59 = vrot.slane %v1421_v52, 2  ;;  %v1427_v60 = vmax.f32 %v1413_v49, %v1426_v53  ;;  %v1408_v61 = vadd.f32 %v2040_v31, %v1385_v58  ;;  %v2289_v62 = vpop.f32.mrb[22].mxu1 }
 0x43a   : > { %v1435_v63 = vmax.f32 %v1433_v50, %v1434_v55  ;;  %v1440_v1 = vrot.slane %v1439_v56, 2  ;;  %v1418_v2 = vmax.f32 %v1410_v57, 0.0  ;;  %v1411_v3 = vadd.f32 %v2289_v62, %v2040_v31  ;;  %v1388_v4 = vpop.f32.mrb[23].mxu1 }
 0x43b   : > { %v1423_v5 = vmax.f32 %v1421_v52, %v1422_v59  ;;  %v1428_v6 = vrot.slane %v1427_v60, 2  ;;  %v1416_v7 = vmax.f32 %v1408_v61, 0.0  ;;  %v1409_v8 = vadd.f32 %v2040_v31, %v1388_v4 }
 0x43c   : > { %v1436_v9 = vrot.slane %v1435_v63, 1  ;;  %v1441_v10 = vmax.f32 %v1439_v56, %v1440_v1  ;;  %v1456_v11 = vrot.slane %v1418_v2, 4  ;;  %v1419_v12 = vmax.f32 %v1411_v3, 0.0 }
 0x43d   : > { %v1424_v13 = vrot.slane %v1423_v5, 1  ;;  %v1429_v14 = vmax.f32 %v1427_v60, %v1428_v6  ;;  %v1444_v15 = vrot.slane %v1416_v7, 4  ;;  %v1417_v16 = vmax.f32 %v1409_v8, 0.0 }
 0x43e   : > { %v1437_v17 = vmax.f32 %v1435_v63, %v1436_v9  ;;  %v1442_v18 = vrot.slane %v1441_v10, 1  ;;  %v1457_v19 = vmax.f32 %v1418_v2, %v1456_v11  ;;  %v1462_v20 = vrot.slane %v1419_v12, 4 }
 0x43f   : > { %v1425_v21 = vmax.f32 %v1423_v5, %v1424_v13  ;;  %v1430_v22 = vrot.slane %v1429_v14, 1  ;;  %v1445_v23 = vmax.f32 %v1416_v7, %v1444_v15  ;;  %v1450_v24 = vrot.slane %v1417_v16, 4  ;;  %v2060_v7 = vld [vmem:[%s3087_s4 + $0x6] ss:$0 sm:$0xff] }
 0x440   : > { %v1443_v25 = vmax.f32 %v1441_v10, %v1442_v18  ;;  %v1458_v26 = vrot.slane %v1457_v19, 2  ;;  %v1463_v27 = vmax.f32 %v1419_v12, %v1462_v20  ;;  %v1470_v32 = vpack.c.bf16 %v1437_v17, %v1437_v17 }
 0x441   : > { %v1468_v28 = vpack.c.bf16 %v1425_v21, %v1425_v21  ;;  %v1431_v29 = vmax.f32 %v1429_v14, %v1430_v22  ;;  %v1446_v30 = vrot.slane %v1445_v23, 2  ;;  %v1451_v31 = vmax.f32 %v1417_v16, %v1450_v24 }
 0x442   : > { %v1459_v33 = vmax.f32 %v1457_v19, %v1458_v26  ;;  %v1464_v34 = vrot.slane %v1463_v27, 2  ;;  %v1471_v35 = vpack.c.bf16 %v1443_v25, %v1443_v25  ;;  %v1698_v45 = vunpack.c.l.b16 %v1470_v32 }
 0x443   : > { %v1469_v36 = vpack.c.bf16 %v1431_v29, %v1431_v29  ;;  %v1447_v37 = vmax.f32 %v1445_v23, %v1446_v30  ;;  %v1452_v38 = vrot.slane %v1451_v31, 2  ;;  %v1696_v41 = vunpack.c.l.b16 %v1468_v28 }
 0x444   : > { %v1460_v39 = vrot.slane %v1459_v33, 1  ;;  %v1465_v40 = vmax.f32 %v1463_v27, %v1464_v34  ;;  %v1699_v48 = vunpack.c.l.b16 %v1471_v35 }
 0x445   : > { %v1697_v42 = vunpack.c.l.b16 %v1469_v36  ;;  %v1448_v43 = vrot.slane %v1447_v37, 1  ;;  %v1453_v44 = vmax.f32 %v1451_v31, %v1452_v38 }
 0x446   : > { %v1461_v46 = vmax.f32 %v1459_v33, %v1460_v39  ;;  %v1466_v47 = vrot.slane %v1465_v40, 1 }
 0x447   : > { %v1704_v49 = vsel %vm1512_vm3, %v1697_v42, %v1696_v41  ;;  %v1449_v50 = vmax.f32 %v1447_v37, %v1448_v43  ;;  %v1454_v51 = vrot.slane %v1453_v44, 1 }
 0x448   : > { %v1705_v52 = vsel %vm1514_vm4, %v1698_v45, %v1704_v49  ;;  %v1467_v53 = vmax.f32 %v1465_v40, %v1466_v47  ;;  %v1474_v57 = vpack.c.bf16 %v1461_v46, %v1461_v46 }
 0x449   : > { %v1472_v54 = vpack.c.bf16 %v1449_v50, %v1449_v50  ;;  %v1706_v55 = vsel %vm1516_vm5, %v1699_v48, %v1705_v52  ;;  %v1455_v56 = vmax.f32 %v1453_v44, %v1454_v51 }
 0x44a   : > { %v1475_v59 = vpack.c.bf16 %v1467_v53, %v1467_v53  ;;  %v1702_v63 = vunpack.c.l.b16 %v1474_v57 }
 0x44b   : > { %v1700_v58 = vunpack.c.l.b16 %v1472_v54  ;;  %v1473_v60 = vpack.c.bf16 %v1455_v56, %v1455_v56 }
 0x44c   : > { %v1703_v1 = vunpack.c.l.b16 %v1475_v59 }
 0x44d   : > { %v1707_v61 = vsel %vm1518_vm6, %v1700_v58, %v1706_v55  ;;  %v1701_v62 = vunpack.c.l.b16 %v1473_v60 }
 0x44f   : > { %v1708_v2 = vsel %vm1520_vm7, %v1701_v62, %v1707_v61 }
 0x450   : > { %v1709_v3 = vsel %vm1522_vm8, %v1702_v63, %v1708_v2 }
 0x451   : > { %v1710_v4 = vsel %vm1524_vm9, %v1703_v1, %v1709_v3 }
 0x452   : > { %v1711_v5 = vpack.c.b16 %v1710_v4, %v1710_v4 }
 0x454   : > { %2335 = vmatmul.mubr.bf16.vlgmr.msra.gmra.mrb[24].mxu1 %v1711_v5 }
 0x527   : > { %v1795_v6 = vpop.f32.mrb[24].mxu1 }
 0x528   : > { %v1801_v8 = vadd.f32 %v1795_v6, %v3021_v0  ;;  %v2336_v9 = vpop.f32.mrb[25].mxu1 }
 0x529   : > { %v1798_v10 = vpop.f32.mrb[26].mxu1 }
 0x52a   : > { %v1807_v11 = vadd.f32 %v2060_v7, %v1801_v8  ;;  %v2337_v12 = vpop.f32.mrb[27].mxu1 }
 0x52c   : > { %v1808_v13 = vmax.f32 %v1807_v11, 0.0 }
 0x52e   : > { %1809 = vst [vmem:[%s331_s29] sm:$0xff] %v1808_v13 }
 0x52f   : > { %2606 = shalt.err (!%p2603_p11)
}
 0x530   : > { %s2607_s13 = scalar_lea.hbm %s3039_s6, 128  ;;  %s2611_s1 = scalar_lea.hbm %s3088_s5, 256 }
 0x531   : > { %p2608_p13 = scmp.ne.s32.totalorder %s3039_s6, %s2607_s13  ;;  %p2612_p10 = scmp.lt.u32.totalorder %s3039_s6, %s3088_s5 }
 0x532   : > { %p2613_p1 = scmp.lt.u32.totalorder %s2611_s1, %s2607_s13  ;;  %p2615_p3 = scmp.lt.u32.totalorder %s2607_s13, %s3039_s6 }
 0x533   : > { %p2609_p2 = pnand %p2608_p13, %p3130_p9 }
 0x534   : > { %p2614_p0 = por %p2613_p1, %p2612_p10 }
 0x535   : > { %p2610_p6 = pneg %p2609_p2 }
 0x536   : > { %p2616_p12 = por %p2615_p3, %p2614_p0 }
 0x538   : > { %p2617_p4 = pnand %p2616_p12, %p2610_p6 }
 0x53a   : > { %2620 = shalt.err (!%p2617_p4)
}
 0x53b   : > { %2350 = dma.vmem_to_hbm [thread:$0]  (%p3130_p9), %s3041_s11, 128, %s3039_s6, %s1811_s8  }
 0x53c PF: > { %s3131_s25 = sld [smem:[#allocation19_spill]]  ;;  %s3132_s12 = sld [smem:[#allocation16_spill]] }
 0x53d   : > { %s1836_s9 = sand.u32 1, %s2655_s18  }
 0x53e   : > { %s1837_s26 = scalar_lea.sflag [#allocation4], %s1836_s9 }
 0x542   : > { %p3133_p8 = scmp.ne.s32.totalorder %s3131_s25, 0  ;;  %p3134_p5 = scmp.ge.s32.totalorder %s3132_s12, 2 }
 0x544   : > { %p2367_p7 = pnand %p3134_p5, %p3133_p8 }
 0x546   : > { %2650 = dma.done.wait (!%p2367_p7), %s1837_s26, 128  }
 0x547   : > { %2652 = vsyncadd (!%p2367_p7), %s1837_s26, 4294967168  ;;  %s3135_s21 = sld [smem:[#allocation17_spill]]  ;;  %s3136_s14 = sld [smem:[#allocation15_spill]] }
 0x548   : > { %s3137_s20 = sld [smem:[#allocation18_spill]]  ;;  %s3138_s18 = smov %s2659_s19 }
 0x54d   : > { %p22_p11 = scmp.ge.s32.totalorder %s3135_s21, 4   ;;  %s3139_s19 = smov %s3136_s14 }
 0x54f   :  { %24 = sbr.rel (!%p22_p11) target bundleno = 10 (0xa), region = 113 }
 0x556   :  { %1842 = vsyncpa [#allocation3], 1 }
 0x557   :  { %1844 = vsyncpa [#allocation3 + $0x1], 1 }
 0x558   :  { %1845 = vsyncpa [#allocation6], 1 }
 0x559   :  { %1847 = vsyncpa [#allocation6 + $0x1], 1 }
 0x55a   :  { %1848 = vsyncpa [#allocation9], 1 }
 0x55b   :  { %1849 = vsyncpa [#allocation4], 1 }
 0x55c   :  { %1851 = vsyncpa [#allocation4 + $0x1], 1 }

</bundles_post_ra>
